<compile_context>
chip_gen: v7x
topology: tpu7x:2x2x1
jax: 0.10.0
libtpu: 0.0.40
codegen_flags: <defaults>
</compile_context>

<pallas_src>
import jax
import jax.numpy as jnp
from jax.experimental import pallas as pl
from jax.experimental.pallas import tpu as pltpu


# ----------------------------- Fused forward kernel -------------------------
def fused_forward_kernel(ids_ref, w0eff_ref, whh0_ref, b0_ref,
                         wih1_ref, whh1_ref, b1_ref,
                         wih2_ref, whh2_ref, b2_ref,
                         weff_ref, beff_ref,
                         out_ref):
    # ids_ref  : (T*B, 1) int32, time-major token ids
    # w0eff    : (Vp, 4H)  = emb_pad @ W_ih0  (embedding folded into layer-0 proj)
    # whhL     : (H, 4H), bL: (1, 4H) (b_ih + b_hh combined), wihL: (H, 4H) for L>0
    # weff     : (T*H, C) folded MLP weight, beff: (1, C) folded MLP bias
    TB = ids_ref.shape[0]
    B, C = out_ref.shape
    T = TB // B
    H = whh0_ref.shape[0]
    Vp = w0eff_ref.shape[0]

    # ---- Embedding gather + layer-0 input projection: ONE MXU pass ----
    # onehot @ (emb @ W_ih0) == (onehot @ emb) @ W_ih0  (exact row-select)
    ids = ids_ref[...]                                            # (T*B, 1)
    lane = jax.lax.broadcasted_iota(jnp.int32, (TB, Vp), 1)
    onehot = jnp.where(lane == ids, 1.0, 0.0)                     # (T*B, Vp)
    gx0 = (jnp.dot(onehot, w0eff_ref[...],
                   preferred_element_type=jnp.float32)
           + b0_ref[...])                                         # (T*B, 4H)

    # Loop-invariant weight loads (hoisted out of the unrolled loop).
    whh0 = whh0_ref[...]
    wih1 = wih1_ref[...]
    whh1 = whh1_ref[...]
    b1 = b1_ref[...]
    wih2 = wih2_ref[...]
    whh2 = whh2_ref[...]
    b2 = b2_ref[...]
    weff = weff_ref[...]

    def cell(g, c_prev, first):
        # PyTorch gate order: i, f, g, o
        i_g = jax.nn.sigmoid(g[:, 0:H])
        f_g = jax.nn.sigmoid(g[:, H:2 * H])
        g_g = jnp.tanh(g[:, 2 * H:3 * H])
        o_g = jax.nn.sigmoid(g[:, 3 * H:4 * H])
        c_new = i_g * g_g if first else f_g * c_prev + i_g * g_g
        h_new = o_g * jnp.tanh(c_new)
        return h_new, c_new

    out = beff_ref[...]                    # (1, C); broadcasts on first add
    h0 = c0 = h1 = c1 = h2 = c2 = None

    # ---- Fully unrolled (layer, t) wavefront; all state stays in vregs ----
    for t in range(T):
        first = (t == 0)

        # Layer 0 (input projection was hoisted above).
        g0 = gx0[t * B:(t + 1) * B, :]
        if not first:
            g0 = g0 + jnp.dot(h0, whh0, preferred_element_type=jnp.float32)
        h0, c0 = cell(g0, c0, first)

        # Layer 1 (per-step input projection is off the dependency chain).
        g1 = jnp.dot(h0, wih1, preferred_element_type=jnp.float32) + b1
        if not first:
            g1 = g1 + jnp.dot(h1, whh1, preferred_element_type=jnp.float32)
        h1, c1 = cell(g1, c1, first)

        # Layer 2.
        g2 = jnp.dot(h1, wih2, preferred_element_type=jnp.float32) + b2
        if not first:
            g2 = g2 + jnp.dot(h2, whh2, preferred_element_type=jnp.float32)
        h2, c2 = cell(g2, c2, first)

        # Folded MLP: flatten(B, T*H) @ W_eff == sum_t h2_t @ W_eff[tH:(t+1)H].
        out = out + jnp.dot(h2, weff[t * H:(t + 1) * H, :],
                            preferred_element_type=jnp.float32)

    out_ref[...] = out.astype(out_ref.dtype)


# ------------------------------ Param preparation ----------------------------
def fold_mlp(mlp_pairs):
    """Fold the Identity-activated Linear stack into one (in0, out_last) affine map.
    Exact in real arithmetic (activation=Identity, dropout=identity at inference)."""
    w_eff, b_eff = mlp_pairs[0]
    for w, b in mlp_pairs[1:]:
        b_eff = b_eff @ w + b
        w_eff = w_eff @ w
    return w_eff, b_eff


def prepare_params(params):
    """One-time preprocessing (param-load time, not per forward call)."""
    p = dict(params)
    p["mlp_folded"] = fold_mlp(params["mlp"])
    V, E = params["emb"].shape
    Vp = ((V + 127) // 128) * 128
    # Zero-pad table rows to a lane multiple; ids never index the padding -> exact.
    emb_pad = jnp.pad(params["emb"], ((0, Vp - V), (0, 0)))
    wih0, _, _ = params["lstm"][0]
    # Fold the embedding table into layer-0's input projection.
    p["w0eff"] = emb_pad @ wih0            # (Vp, 4H)
    return p


# ------------------------------ Full forward --------------------------------
def model_forward(x_ids, params):
    B, T = x_ids.shape
    (_, whh0, b0), (wih1, whh1, b1), (wih2, whh2, b2) = params["lstm"]
    w0eff = params["w0eff"]
    w_eff, b_eff = params["mlp_folded"]
    C = w_eff.shape[1]

    # Time-major ids (tiny int reshuffle; everything else lives in the kernel).
    ids_tm = jnp.transpose(x_ids).reshape(T * B, 1).astype(jnp.int32)

    vmem = lambda: pl.BlockSpec(memory_space=pltpu.MemorySpace.VMEM)
    return pl.pallas_call(
        fused_forward_kernel,
        out_shape=jax.ShapeDtypeStruct((B, C), jnp.float32),
        in_specs=[vmem() for _ in range(12)],
        out_specs=vmem(),
    )(ids_tm, w0eff, whh0, b0, wih1, whh1, b1, wih2, whh2, b2, w_eff, b_eff)


# ---------------------------- Pure-JAX reference -----------------------------
def reference_forward(x_ids, params):
    y = jnp.take(params["emb"], x_ids, axis=0)
    h = jnp.transpose(y, (1, 0, 2))
    for (wih, whh, b) in params["lstm"]:
        H = whh.shape[0]
        B = h.shape[1]

        def step(carry, x_t):
            hh, cc = carry
            gates = x_t @ wih + hh @ whh + b
            i = jax.nn.sigmoid(gates[:, 0:H])
            f = jax.nn.sigmoid(gates[:, H:2 * H])
            g = jnp.tanh(gates[:, 2 * H:3 * H])
            o = jax.nn.sigmoid(gates[:, 3 * H:4 * H])
            cc = f * cc + i * g
            hh = o * jnp.tanh(cc)
            return (hh, cc), hh

        (_, _), hs = jax.lax.scan(
            step, (jnp.zeros((B, H), jnp.float32), jnp.zeros((B, H), jnp.float32)), h)
        h = hs
    B = x_ids.shape[0]
    y = jnp.transpose(h, (1, 0, 2)).reshape(B, -1)
    for w, b in params["mlp"]:
        y = y @ w + b
    return y


# ------------------------------ Param init -----------------------------------
def init_params(key, embedSize, hiddenSize, vocabSize, linearSize, numClasses, seqLen):
    def u(k, shape, scale=0.1):
        return jax.random.uniform(k, shape, jnp.float32, -scale, scale)

    keys = iter(jax.random.split(key, 32))
    params = {}
    params["emb"] = u(next(keys), (vocabSize, embedSize))

    lstm = []
    in_dim = embedSize
    for _ in range(3):  # num_layers=3
        wih = u(next(keys), (in_dim, 4 * hiddenSize))        # transposed vs torch (4H, in)
        whh = u(next(keys), (hiddenSize, 4 * hiddenSize))
        b = u(next(keys), (1, 4 * hiddenSize))                # b_ih + b_hh combined
        lstm.append((wih, whh, b))
        in_dim = hiddenSize
    params["lstm"] = lstm

    dims = [hiddenSize * seqLen, linearSize, 1024, 512, 128, 64, numClasses]
    mlp_w = []
    for d_in, d_out in zip(dims[:-1], dims[1:]):
        w = u(next(keys), (d_in, d_out))                      # transposed vs torch (out, in)
        b = u(next(keys), (1, d_out))
        mlp_w.append((w, b))
    params["mlp"] = mlp_w
    return params


# --------------------------------- Main --------------------------------------
if __name__ == "__main__":
    embedSize, hiddenSize, vocabSize = 16, 32, 100
    linearSize, numClasses, seqLen = 64, 10, 8
    batch = 2

    key = jax.random.PRNGKey(0)
    k_in, k_par = jax.random.split(key)
    x_ids = jax.random.randint(k_in, (batch, seqLen), 0, vocabSize, dtype=jnp.int32)
    params = init_params(k_par, embedSize, hiddenSize, vocabSize,
                         linearSize, numClasses, seqLen)
    params = prepare_params(params)   # one-time: fold MLP, pad emb, fold emb into W_ih0

    fwd = jax.jit(model_forward)
    out = jax.block_until_ready(fwd(x_ids, params))
    ref = jax.block_until_ready(reference_forward(x_ids, params))

    assert out.shape == (batch, numClasses), out.shape
    assert jnp.allclose(out, ref, atol=1e-3, rtol=1e-3), (out, ref)
    # TODO(synk): dropout omitted (inference mode); ApplyLogit branch (nn.Sigmoid(y)) not modeled.
    print("KERNEL_OK")
</pallas_src>

<mosaic_0001>
module attributes {stable_mosaic.version = 11 : i64} {
  func.func @fused_forward_kernel(%arg0: memref<16x1xi32, #tpu.memory_space<vmem>>, %arg1: memref<128x128xf32, #tpu.memory_space<vmem>>, %arg2: memref<32x128xf32, #tpu.memory_space<vmem>>, %arg3: memref<1x128xf32, #tpu.memory_space<vmem>>, %arg4: memref<32x128xf32, #tpu.memory_space<vmem>>, %arg5: memref<32x128xf32, #tpu.memory_space<vmem>>, %arg6: memref<1x128xf32, #tpu.memory_space<vmem>>, %arg7: memref<32x128xf32, #tpu.memory_space<vmem>>, %arg8: memref<32x128xf32, #tpu.memory_space<vmem>>, %arg9: memref<1x128xf32, #tpu.memory_space<vmem>>, %arg10: memref<256x10xf32, #tpu.memory_space<vmem>>, %arg11: memref<1x10xf32, #tpu.memory_space<vmem>>, %arg12: memref<2x10xf32, #tpu.memory_space<vmem>>) attributes {dimension_semantics = [], scalar_prefetch = 0 : i64, scratch_operands = 0 : i64, tpu.core_type = #tpu.core_type<tc>} {
    %c0 = arith.constant 0 : index
    %c0_0 = arith.constant 0 : index
    %0 = vector.load %arg0[%c0, %c0_0] : memref<16x1xi32, #tpu.memory_space<vmem>>, vector<16x1xi32>
    %1 = tpu.iota {dimensions = array<i32: 1>} : vector<16x128xi32>
    %2 = vector.broadcast %0 : vector<16x1xi32> to vector<16x128xi32>
    %3 = arith.cmpi eq, %1, %2 : vector<16x128xi32>
    %cst = arith.constant 1.000000e+00 : f32
    %cst_1 = arith.constant 0.000000e+00 : f32
    %4 = vector.broadcast %cst : f32 to vector<16x128xf32>
    %5 = vector.broadcast %cst_1 : f32 to vector<16x128xf32>
    %6 = arith.select %3, %4, %5 : vector<16x128xi1>, vector<16x128xf32>
    %c0_2 = arith.constant 0 : index
    %c0_3 = arith.constant 0 : index
    %7 = vector.load %arg1[%c0_2, %c0_3] : memref<128x128xf32, #tpu.memory_space<vmem>>, vector<128x128xf32>
    %cst_4 = arith.constant dense<0.000000e+00> : vector<16x128xf32>
    %8 = tpu.matmul %6, %7, %cst_4 {dimension_numbers = #tpu.dot_dimension_numbers<[1], [0], [0], [1], [0, 0, 1, 1], [], []>} : vector<16x128xf32>, vector<128x128xf32>, vector<16x128xf32> -> vector<16x128xf32>
    %c0_5 = arith.constant 0 : index
    %c0_6 = arith.constant 0 : index
    %9 = vector.load %arg3[%c0_5, %c0_6] : memref<1x128xf32, #tpu.memory_space<vmem>>, vector<1x128xf32>
    %10 = vector.broadcast %9 : vector<1x128xf32> to vector<16x128xf32>
    %11 = arith.addf %8, %10 : vector<16x128xf32>
    %c0_7 = arith.constant 0 : index
    %c0_8 = arith.constant 0 : index
    %12 = vector.load %arg2[%c0_7, %c0_8] : memref<32x128xf32, #tpu.memory_space<vmem>>, vector<32x128xf32>
    %c0_9 = arith.constant 0 : index
    %c0_10 = arith.constant 0 : index
    %13 = vector.load %arg4[%c0_9, %c0_10] : memref<32x128xf32, #tpu.memory_space<vmem>>, vector<32x128xf32>
    %c0_11 = arith.constant 0 : index
    %c0_12 = arith.constant 0 : index
    %14 = vector.load %arg5[%c0_11, %c0_12] : memref<32x128xf32, #tpu.memory_space<vmem>>, vector<32x128xf32>
    %c0_13 = arith.constant 0 : index
    %c0_14 = arith.constant 0 : index
    %15 = vector.load %arg6[%c0_13, %c0_14] : memref<1x128xf32, #tpu.memory_space<vmem>>, vector<1x128xf32>
    %c0_15 = arith.constant 0 : index
    %c0_16 = arith.constant 0 : index
    %16 = vector.load %arg7[%c0_15, %c0_16] : memref<32x128xf32, #tpu.memory_space<vmem>>, vector<32x128xf32>
    %c0_17 = arith.constant 0 : index
    %c0_18 = arith.constant 0 : index
    %17 = vector.load %arg8[%c0_17, %c0_18] : memref<32x128xf32, #tpu.memory_space<vmem>>, vector<32x128xf32>
    %c0_19 = arith.constant 0 : index
    %c0_20 = arith.constant 0 : index
    %18 = vector.load %arg9[%c0_19, %c0_20] : memref<1x128xf32, #tpu.memory_space<vmem>>, vector<1x128xf32>
    %c0_21 = arith.constant 0 : index
    %c0_22 = arith.constant 0 : index
    %19 = vector.load %arg10[%c0_21, %c0_22] : memref<256x10xf32, #tpu.memory_space<vmem>>, vector<256x10xf32>
    %c0_23 = arith.constant 0 : index
    %c0_24 = arith.constant 0 : index
    %20 = vector.load %arg11[%c0_23, %c0_24] : memref<1x10xf32, #tpu.memory_space<vmem>>, vector<1x10xf32>
    %21 = vector.extract_strided_slice %11 {offsets = [0, 0], sizes = [2, 128], strides = [1, 1]} : vector<16x128xf32> to vector<2x128xf32>
    %22 = vector.extract_strided_slice %21 {offsets = [0, 0], sizes = [2, 32], strides = [1, 1]} : vector<2x128xf32> to vector<2x32xf32>
    %23 = arith.negf %22 : vector<2x32xf32>
    %24 = math.exp %23 : vector<2x32xf32>
    %cst_25 = arith.constant 1.000000e+00 : f32
    %25 = vector.broadcast %cst_25 : f32 to vector<2x32xf32>
    %26 = arith.addf %25, %24 : vector<2x32xf32>
    %27 = arith.divf %25, %26 : vector<2x32xf32>
    %28 = vector.extract_strided_slice %21 {offsets = [0, 64], sizes = [2, 32], strides = [1, 1]} : vector<2x128xf32> to vector<2x32xf32>
    %29 = math.tanh %28 : vector<2x32xf32>
    %30 = vector.extract_strided_slice %21 {offsets = [0, 96], sizes = [2, 32], strides = [1, 1]} : vector<2x128xf32> to vector<2x32xf32>
    %31 = arith.negf %30 : vector<2x32xf32>
    %32 = math.exp %31 : vector<2x32xf32>
    %cst_26 = arith.constant 1.000000e+00 : f32
    %33 = vector.broadcast %cst_26 : f32 to vector<2x32xf32>
    %34 = arith.addf %33, %32 : vector<2x32xf32>
    %35 = arith.divf %33, %34 : vector<2x32xf32>
    %36 = arith.mulf %27, %29 : vector<2x32xf32>
    %37 = math.tanh %36 : vector<2x32xf32>
    %38 = arith.mulf %35, %37 : vector<2x32xf32>
    %cst_27 = arith.constant dense<0.000000e+00> : vector<2x128xf32>
    %39 = tpu.matmul %38, %13, %cst_27 {dimension_numbers = #tpu.dot_dimension_numbers<[1], [0], [0], [1], [0, 0, 1, 1], [], []>} : vector<2x32xf32>, vector<32x128xf32>, vector<2x128xf32> -> vector<2x128xf32>
    %40 = vector.broadcast %15 : vector<1x128xf32> to vector<2x128xf32>
    %41 = arith.addf %39, %40 : vector<2x128xf32>
    %42 = vector.extract_strided_slice %41 {offsets = [0, 0], sizes = [2, 32], strides = [1, 1]} : vector<2x128xf32> to vector<2x32xf32>
    %43 = arith.negf %42 : vector<2x32xf32>
    %44 = math.exp %43 : vector<2x32xf32>
    %cst_28 = arith.constant 1.000000e+00 : f32
    %45 = vector.broadcast %cst_28 : f32 to vector<2x32xf32>
    %46 = arith.addf %45, %44 : vector<2x32xf32>
    %47 = arith.divf %45, %46 : vector<2x32xf32>
    %48 = vector.extract_strided_slice %41 {offsets = [0, 64], sizes = [2, 32], strides = [1, 1]} : vector<2x128xf32> to vector<2x32xf32>
    %49 = math.tanh %48 : vector<2x32xf32>
    %50 = vector.extract_strided_slice %41 {offsets = [0, 96], sizes = [2, 32], strides = [1, 1]} : vector<2x128xf32> to vector<2x32xf32>
    %51 = arith.negf %50 : vector<2x32xf32>
    %52 = math.exp %51 : vector<2x32xf32>
    %cst_29 = arith.constant 1.000000e+00 : f32
    %53 = vector.broadcast %cst_29 : f32 to vector<2x32xf32>
    %54 = arith.addf %53, %52 : vector<2x32xf32>
    %55 = arith.divf %53, %54 : vector<2x32xf32>
    %56 = arith.mulf %47, %49 : vector<2x32xf32>
    %57 = math.tanh %56 : vector<2x32xf32>
    %58 = arith.mulf %55, %57 : vector<2x32xf32>
    %cst_30 = arith.constant dense<0.000000e+00> : vector<2x128xf32>
    %59 = tpu.matmul %58, %16, %cst_30 {dimension_numbers = #tpu.dot_dimension_numbers<[1], [0], [0], [1], [0, 0, 1, 1], [], []>} : vector<2x32xf32>, vector<32x128xf32>, vector<2x128xf32> -> vector<2x128xf32>
    %60 = vector.broadcast %18 : vector<1x128xf32> to vector<2x128xf32>
    %61 = arith.addf %59, %60 : vector<2x128xf32>
    %62 = vector.extract_strided_slice %61 {offsets = [0, 0], sizes = [2, 32], strides = [1, 1]} : vector<2x128xf32> to vector<2x32xf32>
    %63 = arith.negf %62 : vector<2x32xf32>
    %64 = math.exp %63 : vector<2x32xf32>
    %cst_31 = arith.constant 1.000000e+00 : f32
    %65 = vector.broadcast %cst_31 : f32 to vector<2x32xf32>
    %66 = arith.addf %65, %64 : vector<2x32xf32>
    %67 = arith.divf %65, %66 : vector<2x32xf32>
    %68 = vector.extract_strided_slice %61 {offsets = [0, 64], sizes = [2, 32], strides = [1, 1]} : vector<2x128xf32> to vector<2x32xf32>
    %69 = math.tanh %68 : vector<2x32xf32>
    %70 = vector.extract_strided_slice %61 {offsets = [0, 96], sizes = [2, 32], strides = [1, 1]} : vector<2x128xf32> to vector<2x32xf32>
    %71 = arith.negf %70 : vector<2x32xf32>
    %72 = math.exp %71 : vector<2x32xf32>
    %cst_32 = arith.constant 1.000000e+00 : f32
    %73 = vector.broadcast %cst_32 : f32 to vector<2x32xf32>
    %74 = arith.addf %73, %72 : vector<2x32xf32>
    %75 = arith.divf %73, %74 : vector<2x32xf32>
    %76 = arith.mulf %67, %69 : vector<2x32xf32>
    %77 = math.tanh %76 : vector<2x32xf32>
    %78 = arith.mulf %75, %77 : vector<2x32xf32>
    %79 = vector.extract_strided_slice %19 {offsets = [0, 0], sizes = [32, 10], strides = [1, 1]} : vector<256x10xf32> to vector<32x10xf32>
    %cst_33 = arith.constant dense<0.000000e+00> : vector<2x10xf32>
    %80 = tpu.matmul %78, %79, %cst_33 {dimension_numbers = #tpu.dot_dimension_numbers<[1], [0], [0], [1], [0, 0, 1, 1], [], []>} : vector<2x32xf32>, vector<32x10xf32>, vector<2x10xf32> -> vector<2x10xf32>
    %81 = vector.broadcast %20 : vector<1x10xf32> to vector<2x10xf32>
    %82 = arith.addf %81, %80 : vector<2x10xf32>
    %83 = vector.extract_strided_slice %11 {offsets = [2, 0], sizes = [2, 128], strides = [1, 1]} : vector<16x128xf32> to vector<2x128xf32>
    %cst_34 = arith.constant dense<0.000000e+00> : vector<2x128xf32>
    %84 = tpu.matmul %38, %12, %cst_34 {dimension_numbers = #tpu.dot_dimension_numbers<[1], [0], [0], [1], [0, 0, 1, 1], [], []>} : vector<2x32xf32>, vector<32x128xf32>, vector<2x128xf32> -> vector<2x128xf32>
    %85 = arith.addf %83, %84 : vector<2x128xf32>
    %86 = vector.extract_strided_slice %85 {offsets = [0, 0], sizes = [2, 32], strides = [1, 1]} : vector<2x128xf32> to vector<2x32xf32>
    %87 = arith.negf %86 : vector<2x32xf32>
    %88 = math.exp %87 : vector<2x32xf32>
    %cst_35 = arith.constant 1.000000e+00 : f32
    %89 = vector.broadcast %cst_35 : f32 to vector<2x32xf32>
    %90 = arith.addf %89, %88 : vector<2x32xf32>
    %91 = arith.divf %89, %90 : vector<2x32xf32>
    %92 = vector.extract_strided_slice %85 {offsets = [0, 32], sizes = [2, 32], strides = [1, 1]} : vector<2x128xf32> to vector<2x32xf32>
    %93 = arith.negf %92 : vector<2x32xf32>
    %94 = math.exp %93 : vector<2x32xf32>
    %cst_36 = arith.constant 1.000000e+00 : f32
    %95 = vector.broadcast %cst_36 : f32 to vector<2x32xf32>
    %96 = arith.addf %95, %94 : vector<2x32xf32>
    %97 = arith.divf %95, %96 : vector<2x32xf32>
    %98 = vector.extract_strided_slice %85 {offsets = [0, 64], sizes = [2, 32], strides = [1, 1]} : vector<2x128xf32> to vector<2x32xf32>
    %99 = math.tanh %98 : vector<2x32xf32>
    %100 = vector.extract_strided_slice %85 {offsets = [0, 96], sizes = [2, 32], strides = [1, 1]} : vector<2x128xf32> to vector<2x32xf32>
    %101 = arith.negf %100 : vector<2x32xf32>
    %102 = math.exp %101 : vector<2x32xf32>
    %cst_37 = arith.constant 1.000000e+00 : f32
    %103 = vector.broadcast %cst_37 : f32 to vector<2x32xf32>
    %104 = arith.addf %103, %102 : vector<2x32xf32>
    %105 = arith.divf %103, %104 : vector<2x32xf32>
    %106 = arith.mulf %97, %36 : vector<2x32xf32>
    %107 = arith.mulf %91, %99 : vector<2x32xf32>
    %108 = arith.addf %106, %107 : vector<2x32xf32>
    %109 = math.tanh %108 : vector<2x32xf32>
    %110 = arith.mulf %105, %109 : vector<2x32xf32>
    %cst_38 = arith.constant dense<0.000000e+00> : vector<2x128xf32>
    %111 = tpu.matmul %110, %13, %cst_38 {dimension_numbers = #tpu.dot_dimension_numbers<[1], [0], [0], [1], [0, 0, 1, 1], [], []>} : vector<2x32xf32>, vector<32x128xf32>, vector<2x128xf32> -> vector<2x128xf32>
    %112 = vector.broadcast %15 : vector<1x128xf32> to vector<2x128xf32>
    %113 = arith.addf %111, %112 : vector<2x128xf32>
    %cst_39 = arith.constant dense<0.000000e+00> : vector<2x128xf32>
    %114 = tpu.matmul %58, %14, %cst_39 {dimension_numbers = #tpu.dot_dimension_numbers<[1], [0], [0], [1], [0, 0, 1, 1], [], []>} : vector<2x32xf32>, vector<32x128xf32>, vector<2x128xf32> -> vector<2x128xf32>
    %115 = arith.addf %113, %114 : vector<2x128xf32>
    %116 = vector.extract_strided_slice %115 {offsets = [0, 0], sizes = [2, 32], strides = [1, 1]} : vector<2x128xf32> to vector<2x32xf32>
    %117 = arith.negf %116 : vector<2x32xf32>
    %118 = math.exp %117 : vector<2x32xf32>
    %cst_40 = arith.constant 1.000000e+00 : f32
    %119 = vector.broadcast %cst_40 : f32 to vector<2x32xf32>
    %120 = arith.addf %119, %118 : vector<2x32xf32>
    %121 = arith.divf %119, %120 : vector<2x32xf32>
    %122 = vector.extract_strided_slice %115 {offsets = [0, 32], sizes = [2, 32], strides = [1, 1]} : vector<2x128xf32> to vector<2x32xf32>
    %123 = arith.negf %122 : vector<2x32xf32>
    %124 = math.exp %123 : vector<2x32xf32>
    %cst_41 = arith.constant 1.000000e+00 : f32
    %125 = vector.broadcast %cst_41 : f32 to vector<2x32xf32>
    %126 = arith.addf %125, %124 : vector<2x32xf32>
    %127 = arith.divf %125, %126 : vector<2x32xf32>
    %128 = vector.extract_strided_slice %115 {offsets = [0, 64], sizes = [2, 32], strides = [1, 1]} : vector<2x128xf32> to vector<2x32xf32>
    %129 = math.tanh %128 : vector<2x32xf32>
    %130 = vector.extract_strided_slice %115 {offsets = [0, 96], sizes = [2, 32], strides = [1, 1]} : vector<2x128xf32> to vector<2x32xf32>
    %131 = arith.negf %130 : vector<2x32xf32>
    %132 = math.exp %131 : vector<2x32xf32>
    %cst_42 = arith.constant 1.000000e+00 : f32
    %133 = vector.broadcast %cst_42 : f32 to vector<2x32xf32>
    %134 = arith.addf %133, %132 : vector<2x32xf32>
    %135 = arith.divf %133, %134 : vector<2x32xf32>
    %136 = arith.mulf %127, %56 : vector<2x32xf32>
    %137 = arith.mulf %121, %129 : vector<2x32xf32>
    %138 = arith.addf %136, %137 : vector<2x32xf32>
    %139 = math.tanh %138 : vector<2x32xf32>
    %140 = arith.mulf %135, %139 : vector<2x32xf32>
    %cst_43 = arith.constant dense<0.000000e+00> : vector<2x128xf32>
    %141 = tpu.matmul %140, %16, %cst_43 {dimension_numbers = #tpu.dot_dimension_numbers<[1], [0], [0], [1], [0, 0, 1, 1], [], []>} : vector<2x32xf32>, vector<32x128xf32>, vector<2x128xf32> -> vector<2x128xf32>
    %142 = vector.broadcast %18 : vector<1x128xf32> to vector<2x128xf32>
    %143 = arith.addf %141, %142 : vector<2x128xf32>
    %cst_44 = arith.constant dense<0.000000e+00> : vector<2x128xf32>
    %144 = tpu.matmul %78, %17, %cst_44 {dimension_numbers = #tpu.dot_dimension_numbers<[1], [0], [0], [1], [0, 0, 1, 1], [], []>} : vector<2x32xf32>, vector<32x128xf32>, vector<2x128xf32> -> vector<2x128xf32>
    %145 = arith.addf %143, %144 : vector<2x128xf32>
    %146 = vector.extract_strided_slice %145 {offsets = [0, 0], sizes = [2, 32], strides = [1, 1]} : vector<2x128xf32> to vector<2x32xf32>
    %147 = arith.negf %146 : vector<2x32xf32>
    %148 = math.exp %147 : vector<2x32xf32>
    %cst_45 = arith.constant 1.000000e+00 : f32
    %149 = vector.broadcast %cst_45 : f32 to vector<2x32xf32>
    %150 = arith.addf %149, %148 : vector<2x32xf32>
    %151 = arith.divf %149, %150 : vector<2x32xf32>
    %152 = vector.extract_strided_slice %145 {offsets = [0, 32], sizes = [2, 32], strides = [1, 1]} : vector<2x128xf32> to vector<2x32xf32>
    %153 = arith.negf %152 : vector<2x32xf32>
    %154 = math.exp %153 : vector<2x32xf32>
    %cst_46 = arith.constant 1.000000e+00 : f32
    %155 = vector.broadcast %cst_46 : f32 to vector<2x32xf32>
    %156 = arith.addf %155, %154 : vector<2x32xf32>
    %157 = arith.divf %155, %156 : vector<2x32xf32>
    %158 = vector.extract_strided_slice %145 {offsets = [0, 64], sizes = [2, 32], strides = [1, 1]} : vector<2x128xf32> to vector<2x32xf32>
    %159 = math.tanh %158 : vector<2x32xf32>
    %160 = vector.extract_strided_slice %145 {offsets = [0, 96], sizes = [2, 32], strides = [1, 1]} : vector<2x128xf32> to vector<2x32xf32>
    %161 = arith.negf %160 : vector<2x32xf32>
    %162 = math.exp %161 : vector<2x32xf32>
    %cst_47 = arith.constant 1.000000e+00 : f32
    %163 = vector.broadcast %cst_47 : f32 to vector<2x32xf32>
    %164 = arith.addf %163, %162 : vector<2x32xf32>
    %165 = arith.divf %163, %164 : vector<2x32xf32>
    %166 = arith.mulf %157, %76 : vector<2x32xf32>
    %167 = arith.mulf %151, %159 : vector<2x32xf32>
    %168 = arith.addf %166, %167 : vector<2x32xf32>
    %169 = math.tanh %168 : vector<2x32xf32>
    %170 = arith.mulf %165, %169 : vector<2x32xf32>
    %171 = vector.extract_strided_slice %19 {offsets = [32, 0], sizes = [32, 10], strides = [1, 1]} : vector<256x10xf32> to vector<32x10xf32>
    %cst_48 = arith.constant dense<0.000000e+00> : vector<2x10xf32>
    %172 = tpu.matmul %170, %171, %cst_48 {dimension_numbers = #tpu.dot_dimension_numbers<[1], [0], [0], [1], [0, 0, 1, 1], [], []>} : vector<2x32xf32>, vector<32x10xf32>, vector<2x10xf32> -> vector<2x10xf32>
    %173 = arith.addf %82, %172 : vector<2x10xf32>
    %174 = vector.extract_strided_slice %11 {offsets = [4, 0], sizes = [2, 128], strides = [1, 1]} : vector<16x128xf32> to vector<2x128xf32>
    %cst_49 = arith.constant dense<0.000000e+00> : vector<2x128xf32>
    %175 = tpu.matmul %110, %12, %cst_49 {dimension_numbers = #tpu.dot_dimension_numbers<[1], [0], [0], [1], [0, 0, 1, 1], [], []>} : vector<2x32xf32>, vector<32x128xf32>, vector<2x128xf32> -> vector<2x128xf32>
    %176 = arith.addf %174, %175 : vector<2x128xf32>
    %177 = vector.extract_strided_slice %176 {offsets = [0, 0], sizes = [2, 32], strides = [1, 1]} : vector<2x128xf32> to vector<2x32xf32>
    %178 = arith.negf %177 : vector<2x32xf32>
    %179 = math.exp %178 : vector<2x32xf32>
    %cst_50 = arith.constant 1.000000e+00 : f32
    %180 = vector.broadcast %cst_50 : f32 to vector<2x32xf32>
    %181 = arith.addf %180, %179 : vector<2x32xf32>
    %182 = arith.divf %180, %181 : vector<2x32xf32>
    %183 = vector.extract_strided_slice %176 {offsets = [0, 32], sizes = [2, 32], strides = [1, 1]} : vector<2x128xf32> to vector<2x32xf32>
    %184 = arith.negf %183 : vector<2x32xf32>
    %185 = math.exp %184 : vector<2x32xf32>
    %cst_51 = arith.constant 1.000000e+00 : f32
    %186 = vector.broadcast %cst_51 : f32 to vector<2x32xf32>
    %187 = arith.addf %186, %185 : vector<2x32xf32>
    %188 = arith.divf %186, %187 : vector<2x32xf32>
    %189 = vector.extract_strided_slice %176 {offsets = [0, 64], sizes = [2, 32], strides = [1, 1]} : vector<2x128xf32> to vector<2x32xf32>
    %190 = math.tanh %189 : vector<2x32xf32>
    %191 = vector.extract_strided_slice %176 {offsets = [0, 96], sizes = [2, 32], strides = [1, 1]} : vector<2x128xf32> to vector<2x32xf32>
    %192 = arith.negf %191 : vector<2x32xf32>
    %193 = math.exp %192 : vector<2x32xf32>
    %cst_52 = arith.constant 1.000000e+00 : f32
    %194 = vector.broadcast %cst_52 : f32 to vector<2x32xf32>
    %195 = arith.addf %194, %193 : vector<2x32xf32>
    %196 = arith.divf %194, %195 : vector<2x32xf32>
    %197 = arith.mulf %188, %108 : vector<2x32xf32>
    %198 = arith.mulf %182, %190 : vector<2x32xf32>
    %199 = arith.addf %197, %198 : vector<2x32xf32>
    %200 = math.tanh %199 : vector<2x32xf32>
    %201 = arith.mulf %196, %200 : vector<2x32xf32>
    %cst_53 = arith.constant dense<0.000000e+00> : vector<2x128xf32>
    %202 = tpu.matmul %201, %13, %cst_53 {dimension_numbers = #tpu.dot_dimension_numbers<[1], [0], [0], [1], [0, 0, 1, 1], [], []>} : vector<2x32xf32>, vector<32x128xf32>, vector<2x128xf32> -> vector<2x128xf32>
    %203 = vector.broadcast %15 : vector<1x128xf32> to vector<2x128xf32>
    %204 = arith.addf %202, %203 : vector<2x128xf32>
    %cst_54 = arith.constant dense<0.000000e+00> : vector<2x128xf32>
    %205 = tpu.matmul %140, %14, %cst_54 {dimension_numbers = #tpu.dot_dimension_numbers<[1], [0], [0], [1], [0, 0, 1, 1], [], []>} : vector<2x32xf32>, vector<32x128xf32>, vector<2x128xf32> -> vector<2x128xf32>
    %206 = arith.addf %204, %205 : vector<2x128xf32>
    %207 = vector.extract_strided_slice %206 {offsets = [0, 0], sizes = [2, 32], strides = [1, 1]} : vector<2x128xf32> to vector<2x32xf32>
    %208 = arith.negf %207 : vector<2x32xf32>
    %209 = math.exp %208 : vector<2x32xf32>
    %cst_55 = arith.constant 1.000000e+00 : f32
    %210 = vector.broadcast %cst_55 : f32 to vector<2x32xf32>
    %211 = arith.addf %210, %209 : vector<2x32xf32>
    %212 = arith.divf %210, %211 : vector<2x32xf32>
    %213 = vector.extract_strided_slice %206 {offsets = [0, 32], sizes = [2, 32], strides = [1, 1]} : vector<2x128xf32> to vector<2x32xf32>
    %214 = arith.negf %213 : vector<2x32xf32>
    %215 = math.exp %214 : vector<2x32xf32>
    %cst_56 = arith.constant 1.000000e+00 : f32
    %216 = vector.broadcast %cst_56 : f32 to vector<2x32xf32>
    %217 = arith.addf %216, %215 : vector<2x32xf32>
    %218 = arith.divf %216, %217 : vector<2x32xf32>
    %219 = vector.extract_strided_slice %206 {offsets = [0, 64], sizes = [2, 32], strides = [1, 1]} : vector<2x128xf32> to vector<2x32xf32>
    %220 = math.tanh %219 : vector<2x32xf32>
    %221 = vector.extract_strided_slice %206 {offsets = [0, 96], sizes = [2, 32], strides = [1, 1]} : vector<2x128xf32> to vector<2x32xf32>
    %222 = arith.negf %221 : vector<2x32xf32>
    %223 = math.exp %222 : vector<2x32xf32>
    %cst_57 = arith.constant 1.000000e+00 : f32
    %224 = vector.broadcast %cst_57 : f32 to vector<2x32xf32>
    %225 = arith.addf %224, %223 : vector<2x32xf32>
    %226 = arith.divf %224, %225 : vector<2x32xf32>
    %227 = arith.mulf %218, %138 : vector<2x32xf32>
    %228 = arith.mulf %212, %220 : vector<2x32xf32>
    %229 = arith.addf %227, %228 : vector<2x32xf32>
    %230 = math.tanh %229 : vector<2x32xf32>
    %231 = arith.mulf %226, %230 : vector<2x32xf32>
    %cst_58 = arith.constant dense<0.000000e+00> : vector<2x128xf32>
    %232 = tpu.matmul %231, %16, %cst_58 {dimension_numbers = #tpu.dot_dimension_numbers<[1], [0], [0], [1], [0, 0, 1, 1], [], []>} : vector<2x32xf32>, vector<32x128xf32>, vector<2x128xf32> -> vector<2x128xf32>
    %233 = vector.broadcast %18 : vector<1x128xf32> to vector<2x128xf32>
    %234 = arith.addf %232, %233 : vector<2x128xf32>
    %cst_59 = arith.constant dense<0.000000e+00> : vector<2x128xf32>
    %235 = tpu.matmul %170, %17, %cst_59 {dimension_numbers = #tpu.dot_dimension_numbers<[1], [0], [0], [1], [0, 0, 1, 1], [], []>} : vector<2x32xf32>, vector<32x128xf32>, vector<2x128xf32> -> vector<2x128xf32>
    %236 = arith.addf %234, %235 : vector<2x128xf32>
    %237 = vector.extract_strided_slice %236 {offsets = [0, 0], sizes = [2, 32], strides = [1, 1]} : vector<2x128xf32> to vector<2x32xf32>
    %238 = arith.negf %237 : vector<2x32xf32>
    %239 = math.exp %238 : vector<2x32xf32>
    %cst_60 = arith.constant 1.000000e+00 : f32
    %240 = vector.broadcast %cst_60 : f32 to vector<2x32xf32>
    %241 = arith.addf %240, %239 : vector<2x32xf32>
    %242 = arith.divf %240, %241 : vector<2x32xf32>
    %243 = vector.extract_strided_slice %236 {offsets = [0, 32], sizes = [2, 32], strides = [1, 1]} : vector<2x128xf32> to vector<2x32xf32>
    %244 = arith.negf %243 : vector<2x32xf32>
    %245 = math.exp %244 : vector<2x32xf32>
    %cst_61 = arith.constant 1.000000e+00 : f32
    %246 = vector.broadcast %cst_61 : f32 to vector<2x32xf32>
    %247 = arith.addf %246, %245 : vector<2x32xf32>
    %248 = arith.divf %246, %247 : vector<2x32xf32>
    %249 = vector.extract_strided_slice %236 {offsets = [0, 64], sizes = [2, 32], strides = [1, 1]} : vector<2x128xf32> to vector<2x32xf32>
    %250 = math.tanh %249 : vector<2x32xf32>
    %251 = vector.extract_strided_slice %236 {offsets = [0, 96], sizes = [2, 32], strides = [1, 1]} : vector<2x128xf32> to vector<2x32xf32>
    %252 = arith.negf %251 : vector<2x32xf32>
    %253 = math.exp %252 : vector<2x32xf32>
    %cst_62 = arith.constant 1.000000e+00 : f32
    %254 = vector.broadcast %cst_62 : f32 to vector<2x32xf32>
    %255 = arith.addf %254, %253 : vector<2x32xf32>
    %256 = arith.divf %254, %255 : vector<2x32xf32>
    %257 = arith.mulf %248, %168 : vector<2x32xf32>
    %258 = arith.mulf %242, %250 : vector<2x32xf32>
    %259 = arith.addf %257, %258 : vector<2x32xf32>
    %260 = math.tanh %259 : vector<2x32xf32>
    %261 = arith.mulf %256, %260 : vector<2x32xf32>
    %262 = vector.extract_strided_slice %19 {offsets = [64, 0], sizes = [32, 10], strides = [1, 1]} : vector<256x10xf32> to vector<32x10xf32>
    %cst_63 = arith.constant dense<0.000000e+00> : vector<2x10xf32>
    %263 = tpu.matmul %261, %262, %cst_63 {dimension_numbers = #tpu.dot_dimension_numbers<[1], [0], [0], [1], [0, 0, 1, 1], [], []>} : vector<2x32xf32>, vector<32x10xf32>, vector<2x10xf32> -> vector<2x10xf32>
    %264 = arith.addf %173, %263 : vector<2x10xf32>
    %265 = vector.extract_strided_slice %11 {offsets = [6, 0], sizes = [2, 128], strides = [1, 1]} : vector<16x128xf32> to vector<2x128xf32>
    %cst_64 = arith.constant dense<0.000000e+00> : vector<2x128xf32>
    %266 = tpu.matmul %201, %12, %cst_64 {dimension_numbers = #tpu.dot_dimension_numbers<[1], [0], [0], [1], [0, 0, 1, 1], [], []>} : vector<2x32xf32>, vector<32x128xf32>, vector<2x128xf32> -> vector<2x128xf32>
    %267 = arith.addf %265, %266 : vector<2x128xf32>
    %268 = vector.extract_strided_slice %267 {offsets = [0, 0], sizes = [2, 32], strides = [1, 1]} : vector<2x128xf32> to vector<2x32xf32>
    %269 = arith.negf %268 : vector<2x32xf32>
    %270 = math.exp %269 : vector<2x32xf32>
    %cst_65 = arith.constant 1.000000e+00 : f32
    %271 = vector.broadcast %cst_65 : f32 to vector<2x32xf32>
    %272 = arith.addf %271, %270 : vector<2x32xf32>
    %273 = arith.divf %271, %272 : vector<2x32xf32>
    %274 = vector.extract_strided_slice %267 {offsets = [0, 32], sizes = [2, 32], strides = [1, 1]} : vector<2x128xf32> to vector<2x32xf32>
    %275 = arith.negf %274 : vector<2x32xf32>
    %276 = math.exp %275 : vector<2x32xf32>
    %cst_66 = arith.constant 1.000000e+00 : f32
    %277 = vector.broadcast %cst_66 : f32 to vector<2x32xf32>
    %278 = arith.addf %277, %276 : vector<2x32xf32>
    %279 = arith.divf %277, %278 : vector<2x32xf32>
    %280 = vector.extract_strided_slice %267 {offsets = [0, 64], sizes = [2, 32], strides = [1, 1]} : vector<2x128xf32> to vector<2x32xf32>
    %281 = math.tanh %280 : vector<2x32xf32>
    %282 = vector.extract_strided_slice %267 {offsets = [0, 96], sizes = [2, 32], strides = [1, 1]} : vector<2x128xf32> to vector<2x32xf32>
    %283 = arith.negf %282 : vector<2x32xf32>
    %284 = math.exp %283 : vector<2x32xf32>
    %cst_67 = arith.constant 1.000000e+00 : f32
    %285 = vector.broadcast %cst_67 : f32 to vector<2x32xf32>
    %286 = arith.addf %285, %284 : vector<2x32xf32>
    %287 = arith.divf %285, %286 : vector<2x32xf32>
    %288 = arith.mulf %279, %199 : vector<2x32xf32>
    %289 = arith.mulf %273, %281 : vector<2x32xf32>
    %290 = arith.addf %288, %289 : vector<2x32xf32>
    %291 = math.tanh %290 : vector<2x32xf32>
    %292 = arith.mulf %287, %291 : vector<2x32xf32>
    %cst_68 = arith.constant dense<0.000000e+00> : vector<2x128xf32>
    %293 = tpu.matmul %292, %13, %cst_68 {dimension_numbers = #tpu.dot_dimension_numbers<[1], [0], [0], [1], [0, 0, 1, 1], [], []>} : vector<2x32xf32>, vector<32x128xf32>, vector<2x128xf32> -> vector<2x128xf32>
    %294 = vector.broadcast %15 : vector<1x128xf32> to vector<2x128xf32>
    %295 = arith.addf %293, %294 : vector<2x128xf32>
    %cst_69 = arith.constant dense<0.000000e+00> : vector<2x128xf32>
    %296 = tpu.matmul %231, %14, %cst_69 {dimension_numbers = #tpu.dot_dimension_numbers<[1], [0], [0], [1], [0, 0, 1, 1], [], []>} : vector<2x32xf32>, vector<32x128xf32>, vector<2x128xf32> -> vector<2x128xf32>
    %297 = arith.addf %295, %296 : vector<2x128xf32>
    %298 = vector.extract_strided_slice %297 {offsets = [0, 0], sizes = [2, 32], strides = [1, 1]} : vector<2x128xf32> to vector<2x32xf32>
    %299 = arith.negf %298 : vector<2x32xf32>
    %300 = math.exp %299 : vector<2x32xf32>
    %cst_70 = arith.constant 1.000000e+00 : f32
    %301 = vector.broadcast %cst_70 : f32 to vector<2x32xf32>
    %302 = arith.addf %301, %300 : vector<2x32xf32>
    %303 = arith.divf %301, %302 : vector<2x32xf32>
    %304 = vector.extract_strided_slice %297 {offsets = [0, 32], sizes = [2, 32], strides = [1, 1]} : vector<2x128xf32> to vector<2x32xf32>
    %305 = arith.negf %304 : vector<2x32xf32>
    %306 = math.exp %305 : vector<2x32xf32>
    %cst_71 = arith.constant 1.000000e+00 : f32
    %307 = vector.broadcast %cst_71 : f32 to vector<2x32xf32>
    %308 = arith.addf %307, %306 : vector<2x32xf32>
    %309 = arith.divf %307, %308 : vector<2x32xf32>
    %310 = vector.extract_strided_slice %297 {offsets = [0, 64], sizes = [2, 32], strides = [1, 1]} : vector<2x128xf32> to vector<2x32xf32>
    %311 = math.tanh %310 : vector<2x32xf32>
    %312 = vector.extract_strided_slice %297 {offsets = [0, 96], sizes = [2, 32], strides = [1, 1]} : vector<2x128xf32> to vector<2x32xf32>
    %313 = arith.negf %312 : vector<2x32xf32>
    %314 = math.exp %313 : vector<2x32xf32>
    %cst_72 = arith.constant 1.000000e+00 : f32
    %315 = vector.broadcast %cst_72 : f32 to vector<2x32xf32>
    %316 = arith.addf %315, %314 : vector<2x32xf32>
    %317 = arith.divf %315, %316 : vector<2x32xf32>
    %318 = arith.mulf %309, %229 : vector<2x32xf32>
    %319 = arith.mulf %303, %311 : vector<2x32xf32>
    %320 = arith.addf %318, %319 : vector<2x32xf32>
    %321 = math.tanh %320 : vector<2x32xf32>
    %322 = arith.mulf %317, %321 : vector<2x32xf32>
    %cst_73 = arith.constant dense<0.000000e+00> : vector<2x128xf32>
    %323 = tpu.matmul %322, %16, %cst_73 {dimension_numbers = #tpu.dot_dimension_numbers<[1], [0], [0], [1], [0, 0, 1, 1], [], []>} : vector<2x32xf32>, vector<32x128xf32>, vector<2x128xf32> -> vector<2x128xf32>
    %324 = vector.broadcast %18 : vector<1x128xf32> to vector<2x128xf32>
    %325 = arith.addf %323, %324 : vector<2x128xf32>
    %cst_74 = arith.constant dense<0.000000e+00> : vector<2x128xf32>
    %326 = tpu.matmul %261, %17, %cst_74 {dimension_numbers = #tpu.dot_dimension_numbers<[1], [0], [0], [1], [0, 0, 1, 1], [], []>} : vector<2x32xf32>, vector<32x128xf32>, vector<2x128xf32> -> vector<2x128xf32>
    %327 = arith.addf %325, %326 : vector<2x128xf32>
    %328 = vector.extract_strided_slice %327 {offsets = [0, 0], sizes = [2, 32], strides = [1, 1]} : vector<2x128xf32> to vector<2x32xf32>
    %329 = arith.negf %328 : vector<2x32xf32>
    %330 = math.exp %329 : vector<2x32xf32>
    %cst_75 = arith.constant 1.000000e+00 : f32
    %331 = vector.broadcast %cst_75 : f32 to vector<2x32xf32>
    %332 = arith.addf %331, %330 : vector<2x32xf32>
    %333 = arith.divf %331, %332 : vector<2x32xf32>
    %334 = vector.extract_strided_slice %327 {offsets = [0, 32], sizes = [2, 32], strides = [1, 1]} : vector<2x128xf32> to vector<2x32xf32>
    %335 = arith.negf %334 : vector<2x32xf32>
    %336 = math.exp %335 : vector<2x32xf32>
    %cst_76 = arith.constant 1.000000e+00 : f32
    %337 = vector.broadcast %cst_76 : f32 to vector<2x32xf32>
    %338 = arith.addf %337, %336 : vector<2x32xf32>
    %339 = arith.divf %337, %338 : vector<2x32xf32>
    %340 = vector.extract_strided_slice %327 {offsets = [0, 64], sizes = [2, 32], strides = [1, 1]} : vector<2x128xf32> to vector<2x32xf32>
    %341 = math.tanh %340 : vector<2x32xf32>
    %342 = vector.extract_strided_slice %327 {offsets = [0, 96], sizes = [2, 32], strides = [1, 1]} : vector<2x128xf32> to vector<2x32xf32>
    %343 = arith.negf %342 : vector<2x32xf32>
    %344 = math.exp %343 : vector<2x32xf32>
    %cst_77 = arith.constant 1.000000e+00 : f32
    %345 = vector.broadcast %cst_77 : f32 to vector<2x32xf32>
    %346 = arith.addf %345, %344 : vector<2x32xf32>
    %347 = arith.divf %345, %346 : vector<2x32xf32>
    %348 = arith.mulf %339, %259 : vector<2x32xf32>
    %349 = arith.mulf %333, %341 : vector<2x32xf32>
    %350 = arith.addf %348, %349 : vector<2x32xf32>
    %351 = math.tanh %350 : vector<2x32xf32>
    %352 = arith.mulf %347, %351 : vector<2x32xf32>
    %353 = vector.extract_strided_slice %19 {offsets = [96, 0], sizes = [32, 10], strides = [1, 1]} : vector<256x10xf32> to vector<32x10xf32>
    %cst_78 = arith.constant dense<0.000000e+00> : vector<2x10xf32>
    %354 = tpu.matmul %352, %353, %cst_78 {dimension_numbers = #tpu.dot_dimension_numbers<[1], [0], [0], [1], [0, 0, 1, 1], [], []>} : vector<2x32xf32>, vector<32x10xf32>, vector<2x10xf32> -> vector<2x10xf32>
    %355 = arith.addf %264, %354 : vector<2x10xf32>
    %356 = vector.extract_strided_slice %11 {offsets = [8, 0], sizes = [2, 128], strides = [1, 1]} : vector<16x128xf32> to vector<2x128xf32>
    %cst_79 = arith.constant dense<0.000000e+00> : vector<2x128xf32>
    %357 = tpu.matmul %292, %12, %cst_79 {dimension_numbers = #tpu.dot_dimension_numbers<[1], [0], [0], [1], [0, 0, 1, 1], [], []>} : vector<2x32xf32>, vector<32x128xf32>, vector<2x128xf32> -> vector<2x128xf32>
    %358 = arith.addf %356, %357 : vector<2x128xf32>
    %359 = vector.extract_strided_slice %358 {offsets = [0, 0], sizes = [2, 32], strides = [1, 1]} : vector<2x128xf32> to vector<2x32xf32>
    %360 = arith.negf %359 : vector<2x32xf32>
    %361 = math.exp %360 : vector<2x32xf32>
    %cst_80 = arith.constant 1.000000e+00 : f32
    %362 = vector.broadcast %cst_80 : f32 to vector<2x32xf32>
    %363 = arith.addf %362, %361 : vector<2x32xf32>
    %364 = arith.divf %362, %363 : vector<2x32xf32>
    %365 = vector.extract_strided_slice %358 {offsets = [0, 32], sizes = [2, 32], strides = [1, 1]} : vector<2x128xf32> to vector<2x32xf32>
    %366 = arith.negf %365 : vector<2x32xf32>
    %367 = math.exp %366 : vector<2x32xf32>
    %cst_81 = arith.constant 1.000000e+00 : f32
    %368 = vector.broadcast %cst_81 : f32 to vector<2x32xf32>
    %369 = arith.addf %368, %367 : vector<2x32xf32>
    %370 = arith.divf %368, %369 : vector<2x32xf32>
    %371 = vector.extract_strided_slice %358 {offsets = [0, 64], sizes = [2, 32], strides = [1, 1]} : vector<2x128xf32> to vector<2x32xf32>
    %372 = math.tanh %371 : vector<2x32xf32>
    %373 = vector.extract_strided_slice %358 {offsets = [0, 96], sizes = [2, 32], strides = [1, 1]} : vector<2x128xf32> to vector<2x32xf32>
    %374 = arith.negf %373 : vector<2x32xf32>
    %375 = math.exp %374 : vector<2x32xf32>
    %cst_82 = arith.constant 1.000000e+00 : f32
    %376 = vector.broadcast %cst_82 : f32 to vector<2x32xf32>
    %377 = arith.addf %376, %375 : vector<2x32xf32>
    %378 = arith.divf %376, %377 : vector<2x32xf32>
    %379 = arith.mulf %370, %290 : vector<2x32xf32>
    %380 = arith.mulf %364, %372 : vector<2x32xf32>
    %381 = arith.addf %379, %380 : vector<2x32xf32>
    %382 = math.tanh %381 : vector<2x32xf32>
    %383 = arith.mulf %378, %382 : vector<2x32xf32>
    %cst_83 = arith.constant dense<0.000000e+00> : vector<2x128xf32>
    %384 = tpu.matmul %383, %13, %cst_83 {dimension_numbers = #tpu.dot_dimension_numbers<[1], [0], [0], [1], [0, 0, 1, 1], [], []>} : vector<2x32xf32>, vector<32x128xf32>, vector<2x128xf32> -> vector<2x128xf32>
    %385 = vector.broadcast %15 : vector<1x128xf32> to vector<2x128xf32>
    %386 = arith.addf %384, %385 : vector<2x128xf32>
    %cst_84 = arith.constant dense<0.000000e+00> : vector<2x128xf32>
    %387 = tpu.matmul %322, %14, %cst_84 {dimension_numbers = #tpu.dot_dimension_numbers<[1], [0], [0], [1], [0, 0, 1, 1], [], []>} : vector<2x32xf32>, vector<32x128xf32>, vector<2x128xf32> -> vector<2x128xf32>
    %388 = arith.addf %386, %387 : vector<2x128xf32>
    %389 = vector.extract_strided_slice %388 {offsets = [0, 0], sizes = [2, 32], strides = [1, 1]} : vector<2x128xf32> to vector<2x32xf32>
    %390 = arith.negf %389 : vector<2x32xf32>
    %391 = math.exp %390 : vector<2x32xf32>
    %cst_85 = arith.constant 1.000000e+00 : f32
    %392 = vector.broadcast %cst_85 : f32 to vector<2x32xf32>
    %393 = arith.addf %392, %391 : vector<2x32xf32>
    %394 = arith.divf %392, %393 : vector<2x32xf32>
    %395 = vector.extract_strided_slice %388 {offsets = [0, 32], sizes = [2, 32], strides = [1, 1]} : vector<2x128xf32> to vector<2x32xf32>
    %396 = arith.negf %395 : vector<2x32xf32>
    %397 = math.exp %396 : vector<2x32xf32>
    %cst_86 = arith.constant 1.000000e+00 : f32
    %398 = vector.broadcast %cst_86 : f32 to vector<2x32xf32>
    %399 = arith.addf %398, %397 : vector<2x32xf32>
    %400 = arith.divf %398, %399 : vector<2x32xf32>
    %401 = vector.extract_strided_slice %388 {offsets = [0, 64], sizes = [2, 32], strides = [1, 1]} : vector<2x128xf32> to vector<2x32xf32>
    %402 = math.tanh %401 : vector<2x32xf32>
    %403 = vector.extract_strided_slice %388 {offsets = [0, 96], sizes = [2, 32], strides = [1, 1]} : vector<2x128xf32> to vector<2x32xf32>
    %404 = arith.negf %403 : vector<2x32xf32>
    %405 = math.exp %404 : vector<2x32xf32>
    %cst_87 = arith.constant 1.000000e+00 : f32
    %406 = vector.broadcast %cst_87 : f32 to vector<2x32xf32>
    %407 = arith.addf %406, %405 : vector<2x32xf32>
    %408 = arith.divf %406, %407 : vector<2x32xf32>
    %409 = arith.mulf %400, %320 : vector<2x32xf32>
    %410 = arith.mulf %394, %402 : vector<2x32xf32>
    %411 = arith.addf %409, %410 : vector<2x32xf32>
    %412 = math.tanh %411 : vector<2x32xf32>
    %413 = arith.mulf %408, %412 : vector<2x32xf32>
    %cst_88 = arith.constant dense<0.000000e+00> : vector<2x128xf32>
    %414 = tpu.matmul %413, %16, %cst_88 {dimension_numbers = #tpu.dot_dimension_numbers<[1], [0], [0], [1], [0, 0, 1, 1], [], []>} : vector<2x32xf32>, vector<32x128xf32>, vector<2x128xf32> -> vector<2x128xf32>
    %415 = vector.broadcast %18 : vector<1x128xf32> to vector<2x128xf32>
    %416 = arith.addf %414, %415 : vector<2x128xf32>
    %cst_89 = arith.constant dense<0.000000e+00> : vector<2x128xf32>
    %417 = tpu.matmul %352, %17, %cst_89 {dimension_numbers = #tpu.dot_dimension_numbers<[1], [0], [0], [1], [0, 0, 1, 1], [], []>} : vector<2x32xf32>, vector<32x128xf32>, vector<2x128xf32> -> vector<2x128xf32>
    %418 = arith.addf %416, %417 : vector<2x128xf32>
    %419 = vector.extract_strided_slice %418 {offsets = [0, 0], sizes = [2, 32], strides = [1, 1]} : vector<2x128xf32> to vector<2x32xf32>
    %420 = arith.negf %419 : vector<2x32xf32>
    %421 = math.exp %420 : vector<2x32xf32>
    %cst_90 = arith.constant 1.000000e+00 : f32
    %422 = vector.broadcast %cst_90 : f32 to vector<2x32xf32>
    %423 = arith.addf %422, %421 : vector<2x32xf32>
    %424 = arith.divf %422, %423 : vector<2x32xf32>
    %425 = vector.extract_strided_slice %418 {offsets = [0, 32], sizes = [2, 32], strides = [1, 1]} : vector<2x128xf32> to vector<2x32xf32>
    %426 = arith.negf %425 : vector<2x32xf32>
    %427 = math.exp %426 : vector<2x32xf32>
    %cst_91 = arith.constant 1.000000e+00 : f32
    %428 = vector.broadcast %cst_91 : f32 to vector<2x32xf32>
    %429 = arith.addf %428, %427 : vector<2x32xf32>
    %430 = arith.divf %428, %429 : vector<2x32xf32>
    %431 = vector.extract_strided_slice %418 {offsets = [0, 64], sizes = [2, 32], strides = [1, 1]} : vector<2x128xf32> to vector<2x32xf32>
    %432 = math.tanh %431 : vector<2x32xf32>
    %433 = vector.extract_strided_slice %418 {offsets = [0, 96], sizes = [2, 32], strides = [1, 1]} : vector<2x128xf32> to vector<2x32xf32>
    %434 = arith.negf %433 : vector<2x32xf32>
    %435 = math.exp %434 : vector<2x32xf32>
    %cst_92 = arith.constant 1.000000e+00 : f32
    %436 = vector.broadcast %cst_92 : f32 to vector<2x32xf32>
    %437 = arith.addf %436, %435 : vector<2x32xf32>
    %438 = arith.divf %436, %437 : vector<2x32xf32>
    %439 = arith.mulf %430, %350 : vector<2x32xf32>
    %440 = arith.mulf %424, %432 : vector<2x32xf32>
    %441 = arith.addf %439, %440 : vector<2x32xf32>
    %442 = math.tanh %441 : vector<2x32xf32>
    %443 = arith.mulf %438, %442 : vector<2x32xf32>
    %444 = vector.extract_strided_slice %19 {offsets = [128, 0], sizes = [32, 10], strides = [1, 1]} : vector<256x10xf32> to vector<32x10xf32>
    %cst_93 = arith.constant dense<0.000000e+00> : vector<2x10xf32>
    %445 = tpu.matmul %443, %444, %cst_93 {dimension_numbers = #tpu.dot_dimension_numbers<[1], [0], [0], [1], [0, 0, 1, 1], [], []>} : vector<2x32xf32>, vector<32x10xf32>, vector<2x10xf32> -> vector<2x10xf32>
    %446 = arith.addf %355, %445 : vector<2x10xf32>
    %447 = vector.extract_strided_slice %11 {offsets = [10, 0], sizes = [2, 128], strides = [1, 1]} : vector<16x128xf32> to vector<2x128xf32>
    %cst_94 = arith.constant dense<0.000000e+00> : vector<2x128xf32>
    %448 = tpu.matmul %383, %12, %cst_94 {dimension_numbers = #tpu.dot_dimension_numbers<[1], [0], [0], [1], [0, 0, 1, 1], [], []>} : vector<2x32xf32>, vector<32x128xf32>, vector<2x128xf32> -> vector<2x128xf32>
    %449 = arith.addf %447, %448 : vector<2x128xf32>
    %450 = vector.extract_strided_slice %449 {offsets = [0, 0], sizes = [2, 32], strides = [1, 1]} : vector<2x128xf32> to vector<2x32xf32>
    %451 = arith.negf %450 : vector<2x32xf32>
    %452 = math.exp %451 : vector<2x32xf32>
    %cst_95 = arith.constant 1.000000e+00 : f32
    %453 = vector.broadcast %cst_95 : f32 to vector<2x32xf32>
    %454 = arith.addf %453, %452 : vector<2x32xf32>
    %455 = arith.divf %453, %454 : vector<2x32xf32>
    %456 = vector.extract_strided_slice %449 {offsets = [0, 32], sizes = [2, 32], strides = [1, 1]} : vector<2x128xf32> to vector<2x32xf32>
    %457 = arith.negf %456 : vector<2x32xf32>
    %458 = math.exp %457 : vector<2x32xf32>
    %cst_96 = arith.constant 1.000000e+00 : f32
    %459 = vector.broadcast %cst_96 : f32 to vector<2x32xf32>
    %460 = arith.addf %459, %458 : vector<2x32xf32>
    %461 = arith.divf %459, %460 : vector<2x32xf32>
    %462 = vector.extract_strided_slice %449 {offsets = [0, 64], sizes = [2, 32], strides = [1, 1]} : vector<2x128xf32> to vector<2x32xf32>
    %463 = math.tanh %462 : vector<2x32xf32>
    %464 = vector.extract_strided_slice %449 {offsets = [0, 96], sizes = [2, 32], strides = [1, 1]} : vector<2x128xf32> to vector<2x32xf32>
    %465 = arith.negf %464 : vector<2x32xf32>
    %466 = math.exp %465 : vector<2x32xf32>
    %cst_97 = arith.constant 1.000000e+00 : f32
    %467 = vector.broadcast %cst_97 : f32 to vector<2x32xf32>
    %468 = arith.addf %467, %466 : vector<2x32xf32>
    %469 = arith.divf %467, %468 : vector<2x32xf32>
    %470 = arith.mulf %461, %381 : vector<2x32xf32>
    %471 = arith.mulf %455, %463 : vector<2x32xf32>
    %472 = arith.addf %470, %471 : vector<2x32xf32>
    %473 = math.tanh %472 : vector<2x32xf32>
    %474 = arith.mulf %469, %473 : vector<2x32xf32>
    %cst_98 = arith.constant dense<0.000000e+00> : vector<2x128xf32>
    %475 = tpu.matmul %474, %13, %cst_98 {dimension_numbers = #tpu.dot_dimension_numbers<[1], [0], [0], [1], [0, 0, 1, 1], [], []>} : vector<2x32xf32>, vector<32x128xf32>, vector<2x128xf32> -> vector<2x128xf32>
    %476 = vector.broadcast %15 : vector<1x128xf32> to vector<2x128xf32>
    %477 = arith.addf %475, %476 : vector<2x128xf32>
    %cst_99 = arith.constant dense<0.000000e+00> : vector<2x128xf32>
    %478 = tpu.matmul %413, %14, %cst_99 {dimension_numbers = #tpu.dot_dimension_numbers<[1], [0], [0], [1], [0, 0, 1, 1], [], []>} : vector<2x32xf32>, vector<32x128xf32>, vector<2x128xf32> -> vector<2x128xf32>
    %479 = arith.addf %477, %478 : vector<2x128xf32>
    %480 = vector.extract_strided_slice %479 {offsets = [0, 0], sizes = [2, 32], strides = [1, 1]} : vector<2x128xf32> to vector<2x32xf32>
    %481 = arith.negf %480 : vector<2x32xf32>
    %482 = math.exp %481 : vector<2x32xf32>
    %cst_100 = arith.constant 1.000000e+00 : f32
    %483 = vector.broadcast %cst_100 : f32 to vector<2x32xf32>
    %484 = arith.addf %483, %482 : vector<2x32xf32>
    %485 = arith.divf %483, %484 : vector<2x32xf32>
    %486 = vector.extract_strided_slice %479 {offsets = [0, 32], sizes = [2, 32], strides = [1, 1]} : vector<2x128xf32> to vector<2x32xf32>
    %487 = arith.negf %486 : vector<2x32xf32>
    %488 = math.exp %487 : vector<2x32xf32>
    %cst_101 = arith.constant 1.000000e+00 : f32
    %489 = vector.broadcast %cst_101 : f32 to vector<2x32xf32>
    %490 = arith.addf %489, %488 : vector<2x32xf32>
    %491 = arith.divf %489, %490 : vector<2x32xf32>
    %492 = vector.extract_strided_slice %479 {offsets = [0, 64], sizes = [2, 32], strides = [1, 1]} : vector<2x128xf32> to vector<2x32xf32>
    %493 = math.tanh %492 : vector<2x32xf32>
    %494 = vector.extract_strided_slice %479 {offsets = [0, 96], sizes = [2, 32], strides = [1, 1]} : vector<2x128xf32> to vector<2x32xf32>
    %495 = arith.negf %494 : vector<2x32xf32>
    %496 = math.exp %495 : vector<2x32xf32>
    %cst_102 = arith.constant 1.000000e+00 : f32
    %497 = vector.broadcast %cst_102 : f32 to vector<2x32xf32>
    %498 = arith.addf %497, %496 : vector<2x32xf32>
    %499 = arith.divf %497, %498 : vector<2x32xf32>
    %500 = arith.mulf %491, %411 : vector<2x32xf32>
    %501 = arith.mulf %485, %493 : vector<2x32xf32>
    %502 = arith.addf %500, %501 : vector<2x32xf32>
    %503 = math.tanh %502 : vector<2x32xf32>
    %504 = arith.mulf %499, %503 : vector<2x32xf32>
    %cst_103 = arith.constant dense<0.000000e+00> : vector<2x128xf32>
    %505 = tpu.matmul %504, %16, %cst_103 {dimension_numbers = #tpu.dot_dimension_numbers<[1], [0], [0], [1], [0, 0, 1, 1], [], []>} : vector<2x32xf32>, vector<32x128xf32>, vector<2x128xf32> -> vector<2x128xf32>
    %506 = vector.broadcast %18 : vector<1x128xf32> to vector<2x128xf32>
    %507 = arith.addf %505, %506 : vector<2x128xf32>
    %cst_104 = arith.constant dense<0.000000e+00> : vector<2x128xf32>
    %508 = tpu.matmul %443, %17, %cst_104 {dimension_numbers = #tpu.dot_dimension_numbers<[1], [0], [0], [1], [0, 0, 1, 1], [], []>} : vector<2x32xf32>, vector<32x128xf32>, vector<2x128xf32> -> vector<2x128xf32>
    %509 = arith.addf %507, %508 : vector<2x128xf32>
    %510 = vector.extract_strided_slice %509 {offsets = [0, 0], sizes = [2, 32], strides = [1, 1]} : vector<2x128xf32> to vector<2x32xf32>
    %511 = arith.negf %510 : vector<2x32xf32>
    %512 = math.exp %511 : vector<2x32xf32>
    %cst_105 = arith.constant 1.000000e+00 : f32
    %513 = vector.broadcast %cst_105 : f32 to vector<2x32xf32>
    %514 = arith.addf %513, %512 : vector<2x32xf32>
    %515 = arith.divf %513, %514 : vector<2x32xf32>
    %516 = vector.extract_strided_slice %509 {offsets = [0, 32], sizes = [2, 32], strides = [1, 1]} : vector<2x128xf32> to vector<2x32xf32>
    %517 = arith.negf %516 : vector<2x32xf32>
    %518 = math.exp %517 : vector<2x32xf32>
    %cst_106 = arith.constant 1.000000e+00 : f32
    %519 = vector.broadcast %cst_106 : f32 to vector<2x32xf32>
    %520 = arith.addf %519, %518 : vector<2x32xf32>
    %521 = arith.divf %519, %520 : vector<2x32xf32>
    %522 = vector.extract_strided_slice %509 {offsets = [0, 64], sizes = [2, 32], strides = [1, 1]} : vector<2x128xf32> to vector<2x32xf32>
    %523 = math.tanh %522 : vector<2x32xf32>
    %524 = vector.extract_strided_slice %509 {offsets = [0, 96], sizes = [2, 32], strides = [1, 1]} : vector<2x128xf32> to vector<2x32xf32>
    %525 = arith.negf %524 : vector<2x32xf32>
    %526 = math.exp %525 : vector<2x32xf32>
    %cst_107 = arith.constant 1.000000e+00 : f32
    %527 = vector.broadcast %cst_107 : f32 to vector<2x32xf32>
    %528 = arith.addf %527, %526 : vector<2x32xf32>
    %529 = arith.divf %527, %528 : vector<2x32xf32>
    %530 = arith.mulf %521, %441 : vector<2x32xf32>
    %531 = arith.mulf %515, %523 : vector<2x32xf32>
    %532 = arith.addf %530, %531 : vector<2x32xf32>
    %533 = math.tanh %532 : vector<2x32xf32>
    %534 = arith.mulf %529, %533 : vector<2x32xf32>
    %535 = vector.extract_strided_slice %19 {offsets = [160, 0], sizes = [32, 10], strides = [1, 1]} : vector<256x10xf32> to vector<32x10xf32>
    %cst_108 = arith.constant dense<0.000000e+00> : vector<2x10xf32>
    %536 = tpu.matmul %534, %535, %cst_108 {dimension_numbers = #tpu.dot_dimension_numbers<[1], [0], [0], [1], [0, 0, 1, 1], [], []>} : vector<2x32xf32>, vector<32x10xf32>, vector<2x10xf32> -> vector<2x10xf32>
    %537 = arith.addf %446, %536 : vector<2x10xf32>
    %538 = vector.extract_strided_slice %11 {offsets = [12, 0], sizes = [2, 128], strides = [1, 1]} : vector<16x128xf32> to vector<2x128xf32>
    %cst_109 = arith.constant dense<0.000000e+00> : vector<2x128xf32>
    %539 = tpu.matmul %474, %12, %cst_109 {dimension_numbers = #tpu.dot_dimension_numbers<[1], [0], [0], [1], [0, 0, 1, 1], [], []>} : vector<2x32xf32>, vector<32x128xf32>, vector<2x128xf32> -> vector<2x128xf32>
    %540 = arith.addf %538, %539 : vector<2x128xf32>
    %541 = vector.extract_strided_slice %540 {offsets = [0, 0], sizes = [2, 32], strides = [1, 1]} : vector<2x128xf32> to vector<2x32xf32>
    %542 = arith.negf %541 : vector<2x32xf32>
    %543 = math.exp %542 : vector<2x32xf32>
    %cst_110 = arith.constant 1.000000e+00 : f32
    %544 = vector.broadcast %cst_110 : f32 to vector<2x32xf32>
    %545 = arith.addf %544, %543 : vector<2x32xf32>
    %546 = arith.divf %544, %545 : vector<2x32xf32>
    %547 = vector.extract_strided_slice %540 {offsets = [0, 32], sizes = [2, 32], strides = [1, 1]} : vector<2x128xf32> to vector<2x32xf32>
    %548 = arith.negf %547 : vector<2x32xf32>
    %549 = math.exp %548 : vector<2x32xf32>
    %cst_111 = arith.constant 1.000000e+00 : f32
    %550 = vector.broadcast %cst_111 : f32 to vector<2x32xf32>
    %551 = arith.addf %550, %549 : vector<2x32xf32>
    %552 = arith.divf %550, %551 : vector<2x32xf32>
    %553 = vector.extract_strided_slice %540 {offsets = [0, 64], sizes = [2, 32], strides = [1, 1]} : vector<2x128xf32> to vector<2x32xf32>
    %554 = math.tanh %553 : vector<2x32xf32>
    %555 = vector.extract_strided_slice %540 {offsets = [0, 96], sizes = [2, 32], strides = [1, 1]} : vector<2x128xf32> to vector<2x32xf32>
    %556 = arith.negf %555 : vector<2x32xf32>
    %557 = math.exp %556 : vector<2x32xf32>
    %cst_112 = arith.constant 1.000000e+00 : f32
    %558 = vector.broadcast %cst_112 : f32 to vector<2x32xf32>
    %559 = arith.addf %558, %557 : vector<2x32xf32>
    %560 = arith.divf %558, %559 : vector<2x32xf32>
    %561 = arith.mulf %552, %472 : vector<2x32xf32>
    %562 = arith.mulf %546, %554 : vector<2x32xf32>
    %563 = arith.addf %561, %562 : vector<2x32xf32>
    %564 = math.tanh %563 : vector<2x32xf32>
    %565 = arith.mulf %560, %564 : vector<2x32xf32>
    %cst_113 = arith.constant dense<0.000000e+00> : vector<2x128xf32>
    %566 = tpu.matmul %565, %13, %cst_113 {dimension_numbers = #tpu.dot_dimension_numbers<[1], [0], [0], [1], [0, 0, 1, 1], [], []>} : vector<2x32xf32>, vector<32x128xf32>, vector<2x128xf32> -> vector<2x128xf32>
    %567 = vector.broadcast %15 : vector<1x128xf32> to vector<2x128xf32>
    %568 = arith.addf %566, %567 : vector<2x128xf32>
    %cst_114 = arith.constant dense<0.000000e+00> : vector<2x128xf32>
    %569 = tpu.matmul %504, %14, %cst_114 {dimension_numbers = #tpu.dot_dimension_numbers<[1], [0], [0], [1], [0, 0, 1, 1], [], []>} : vector<2x32xf32>, vector<32x128xf32>, vector<2x128xf32> -> vector<2x128xf32>
    %570 = arith.addf %568, %569 : vector<2x128xf32>
    %571 = vector.extract_strided_slice %570 {offsets = [0, 0], sizes = [2, 32], strides = [1, 1]} : vector<2x128xf32> to vector<2x32xf32>
    %572 = arith.negf %571 : vector<2x32xf32>
    %573 = math.exp %572 : vector<2x32xf32>
    %cst_115 = arith.constant 1.000000e+00 : f32
    %574 = vector.broadcast %cst_115 : f32 to vector<2x32xf32>
    %575 = arith.addf %574, %573 : vector<2x32xf32>
    %576 = arith.divf %574, %575 : vector<2x32xf32>
    %577 = vector.extract_strided_slice %570 {offsets = [0, 32], sizes = [2, 32], strides = [1, 1]} : vector<2x128xf32> to vector<2x32xf32>
    %578 = arith.negf %577 : vector<2x32xf32>
    %579 = math.exp %578 : vector<2x32xf32>
    %cst_116 = arith.constant 1.000000e+00 : f32
    %580 = vector.broadcast %cst_116 : f32 to vector<2x32xf32>
    %581 = arith.addf %580, %579 : vector<2x32xf32>
    %582 = arith.divf %580, %581 : vector<2x32xf32>
    %583 = vector.extract_strided_slice %570 {offsets = [0, 64], sizes = [2, 32], strides = [1, 1]} : vector<2x128xf32> to vector<2x32xf32>
    %584 = math.tanh %583 : vector<2x32xf32>
    %585 = vector.extract_strided_slice %570 {offsets = [0, 96], sizes = [2, 32], strides = [1, 1]} : vector<2x128xf32> to vector<2x32xf32>
    %586 = arith.negf %585 : vector<2x32xf32>
    %587 = math.exp %586 : vector<2x32xf32>
    %cst_117 = arith.constant 1.000000e+00 : f32
    %588 = vector.broadcast %cst_117 : f32 to vector<2x32xf32>
    %589 = arith.addf %588, %587 : vector<2x32xf32>
    %590 = arith.divf %588, %589 : vector<2x32xf32>
    %591 = arith.mulf %582, %502 : vector<2x32xf32>
    %592 = arith.mulf %576, %584 : vector<2x32xf32>
    %593 = arith.addf %591, %592 : vector<2x32xf32>
    %594 = math.tanh %593 : vector<2x32xf32>
    %595 = arith.mulf %590, %594 : vector<2x32xf32>
    %cst_118 = arith.constant dense<0.000000e+00> : vector<2x128xf32>
    %596 = tpu.matmul %595, %16, %cst_118 {dimension_numbers = #tpu.dot_dimension_numbers<[1], [0], [0], [1], [0, 0, 1, 1], [], []>} : vector<2x32xf32>, vector<32x128xf32>, vector<2x128xf32> -> vector<2x128xf32>
    %597 = vector.broadcast %18 : vector<1x128xf32> to vector<2x128xf32>
    %598 = arith.addf %596, %597 : vector<2x128xf32>
    %cst_119 = arith.constant dense<0.000000e+00> : vector<2x128xf32>
    %599 = tpu.matmul %534, %17, %cst_119 {dimension_numbers = #tpu.dot_dimension_numbers<[1], [0], [0], [1], [0, 0, 1, 1], [], []>} : vector<2x32xf32>, vector<32x128xf32>, vector<2x128xf32> -> vector<2x128xf32>
    %600 = arith.addf %598, %599 : vector<2x128xf32>
    %601 = vector.extract_strided_slice %600 {offsets = [0, 0], sizes = [2, 32], strides = [1, 1]} : vector<2x128xf32> to vector<2x32xf32>
    %602 = arith.negf %601 : vector<2x32xf32>
    %603 = math.exp %602 : vector<2x32xf32>
    %cst_120 = arith.constant 1.000000e+00 : f32
    %604 = vector.broadcast %cst_120 : f32 to vector<2x32xf32>
    %605 = arith.addf %604, %603 : vector<2x32xf32>
    %606 = arith.divf %604, %605 : vector<2x32xf32>
    %607 = vector.extract_strided_slice %600 {offsets = [0, 32], sizes = [2, 32], strides = [1, 1]} : vector<2x128xf32> to vector<2x32xf32>
    %608 = arith.negf %607 : vector<2x32xf32>
    %609 = math.exp %608 : vector<2x32xf32>
    %cst_121 = arith.constant 1.000000e+00 : f32
    %610 = vector.broadcast %cst_121 : f32 to vector<2x32xf32>
    %611 = arith.addf %610, %609 : vector<2x32xf32>
    %612 = arith.divf %610, %611 : vector<2x32xf32>
    %613 = vector.extract_strided_slice %600 {offsets = [0, 64], sizes = [2, 32], strides = [1, 1]} : vector<2x128xf32> to vector<2x32xf32>
    %614 = math.tanh %613 : vector<2x32xf32>
    %615 = vector.extract_strided_slice %600 {offsets = [0, 96], sizes = [2, 32], strides = [1, 1]} : vector<2x128xf32> to vector<2x32xf32>
    %616 = arith.negf %615 : vector<2x32xf32>
    %617 = math.exp %616 : vector<2x32xf32>
    %cst_122 = arith.constant 1.000000e+00 : f32
    %618 = vector.broadcast %cst_122 : f32 to vector<2x32xf32>
    %619 = arith.addf %618, %617 : vector<2x32xf32>
    %620 = arith.divf %618, %619 : vector<2x32xf32>
    %621 = arith.mulf %612, %532 : vector<2x32xf32>
    %622 = arith.mulf %606, %614 : vector<2x32xf32>
    %623 = arith.addf %621, %622 : vector<2x32xf32>
    %624 = math.tanh %623 : vector<2x32xf32>
    %625 = arith.mulf %620, %624 : vector<2x32xf32>
    %626 = vector.extract_strided_slice %19 {offsets = [192, 0], sizes = [32, 10], strides = [1, 1]} : vector<256x10xf32> to vector<32x10xf32>
    %cst_123 = arith.constant dense<0.000000e+00> : vector<2x10xf32>
    %627 = tpu.matmul %625, %626, %cst_123 {dimension_numbers = #tpu.dot_dimension_numbers<[1], [0], [0], [1], [0, 0, 1, 1], [], []>} : vector<2x32xf32>, vector<32x10xf32>, vector<2x10xf32> -> vector<2x10xf32>
    %628 = arith.addf %537, %627 : vector<2x10xf32>
    %629 = vector.extract_strided_slice %11 {offsets = [14, 0], sizes = [2, 128], strides = [1, 1]} : vector<16x128xf32> to vector<2x128xf32>
    %cst_124 = arith.constant dense<0.000000e+00> : vector<2x128xf32>
    %630 = tpu.matmul %565, %12, %cst_124 {dimension_numbers = #tpu.dot_dimension_numbers<[1], [0], [0], [1], [0, 0, 1, 1], [], []>} : vector<2x32xf32>, vector<32x128xf32>, vector<2x128xf32> -> vector<2x128xf32>
    %631 = arith.addf %629, %630 : vector<2x128xf32>
    %632 = vector.extract_strided_slice %631 {offsets = [0, 0], sizes = [2, 32], strides = [1, 1]} : vector<2x128xf32> to vector<2x32xf32>
    %633 = arith.negf %632 : vector<2x32xf32>
    %634 = math.exp %633 : vector<2x32xf32>
    %cst_125 = arith.constant 1.000000e+00 : f32
    %635 = vector.broadcast %cst_125 : f32 to vector<2x32xf32>
    %636 = arith.addf %635, %634 : vector<2x32xf32>
    %637 = arith.divf %635, %636 : vector<2x32xf32>
    %638 = vector.extract_strided_slice %631 {offsets = [0, 32], sizes = [2, 32], strides = [1, 1]} : vector<2x128xf32> to vector<2x32xf32>
    %639 = arith.negf %638 : vector<2x32xf32>
    %640 = math.exp %639 : vector<2x32xf32>
    %cst_126 = arith.constant 1.000000e+00 : f32
    %641 = vector.broadcast %cst_126 : f32 to vector<2x32xf32>
    %642 = arith.addf %641, %640 : vector<2x32xf32>
    %643 = arith.divf %641, %642 : vector<2x32xf32>
    %644 = vector.extract_strided_slice %631 {offsets = [0, 64], sizes = [2, 32], strides = [1, 1]} : vector<2x128xf32> to vector<2x32xf32>
    %645 = math.tanh %644 : vector<2x32xf32>
    %646 = vector.extract_strided_slice %631 {offsets = [0, 96], sizes = [2, 32], strides = [1, 1]} : vector<2x128xf32> to vector<2x32xf32>
    %647 = arith.negf %646 : vector<2x32xf32>
    %648 = math.exp %647 : vector<2x32xf32>
    %cst_127 = arith.constant 1.000000e+00 : f32
    %649 = vector.broadcast %cst_127 : f32 to vector<2x32xf32>
    %650 = arith.addf %649, %648 : vector<2x32xf32>
    %651 = arith.divf %649, %650 : vector<2x32xf32>
    %652 = arith.mulf %643, %563 : vector<2x32xf32>
    %653 = arith.mulf %637, %645 : vector<2x32xf32>
    %654 = arith.addf %652, %653 : vector<2x32xf32>
    %655 = math.tanh %654 : vector<2x32xf32>
    %656 = arith.mulf %651, %655 : vector<2x32xf32>
    %cst_128 = arith.constant dense<0.000000e+00> : vector<2x128xf32>
    %657 = tpu.matmul %656, %13, %cst_128 {dimension_numbers = #tpu.dot_dimension_numbers<[1], [0], [0], [1], [0, 0, 1, 1], [], []>} : vector<2x32xf32>, vector<32x128xf32>, vector<2x128xf32> -> vector<2x128xf32>
    %658 = vector.broadcast %15 : vector<1x128xf32> to vector<2x128xf32>
    %659 = arith.addf %657, %658 : vector<2x128xf32>
    %cst_129 = arith.constant dense<0.000000e+00> : vector<2x128xf32>
    %660 = tpu.matmul %595, %14, %cst_129 {dimension_numbers = #tpu.dot_dimension_numbers<[1], [0], [0], [1], [0, 0, 1, 1], [], []>} : vector<2x32xf32>, vector<32x128xf32>, vector<2x128xf32> -> vector<2x128xf32>
    %661 = arith.addf %659, %660 : vector<2x128xf32>
    %662 = vector.extract_strided_slice %661 {offsets = [0, 0], sizes = [2, 32], strides = [1, 1]} : vector<2x128xf32> to vector<2x32xf32>
    %663 = arith.negf %662 : vector<2x32xf32>
    %664 = math.exp %663 : vector<2x32xf32>
    %cst_130 = arith.constant 1.000000e+00 : f32
    %665 = vector.broadcast %cst_130 : f32 to vector<2x32xf32>
    %666 = arith.addf %665, %664 : vector<2x32xf32>
    %667 = arith.divf %665, %666 : vector<2x32xf32>
    %668 = vector.extract_strided_slice %661 {offsets = [0, 32], sizes = [2, 32], strides = [1, 1]} : vector<2x128xf32> to vector<2x32xf32>
    %669 = arith.negf %668 : vector<2x32xf32>
    %670 = math.exp %669 : vector<2x32xf32>
    %cst_131 = arith.constant 1.000000e+00 : f32
    %671 = vector.broadcast %cst_131 : f32 to vector<2x32xf32>
    %672 = arith.addf %671, %670 : vector<2x32xf32>
    %673 = arith.divf %671, %672 : vector<2x32xf32>
    %674 = vector.extract_strided_slice %661 {offsets = [0, 64], sizes = [2, 32], strides = [1, 1]} : vector<2x128xf32> to vector<2x32xf32>
    %675 = math.tanh %674 : vector<2x32xf32>
    %676 = vector.extract_strided_slice %661 {offsets = [0, 96], sizes = [2, 32], strides = [1, 1]} : vector<2x128xf32> to vector<2x32xf32>
    %677 = arith.negf %676 : vector<2x32xf32>
    %678 = math.exp %677 : vector<2x32xf32>
    %cst_132 = arith.constant 1.000000e+00 : f32
    %679 = vector.broadcast %cst_132 : f32 to vector<2x32xf32>
    %680 = arith.addf %679, %678 : vector<2x32xf32>
    %681 = arith.divf %679, %680 : vector<2x32xf32>
    %682 = arith.mulf %673, %593 : vector<2x32xf32>
    %683 = arith.mulf %667, %675 : vector<2x32xf32>
    %684 = arith.addf %682, %683 : vector<2x32xf32>
    %685 = math.tanh %684 : vector<2x32xf32>
    %686 = arith.mulf %681, %685 : vector<2x32xf32>
    %cst_133 = arith.constant dense<0.000000e+00> : vector<2x128xf32>
    %687 = tpu.matmul %686, %16, %cst_133 {dimension_numbers = #tpu.dot_dimension_numbers<[1], [0], [0], [1], [0, 0, 1, 1], [], []>} : vector<2x32xf32>, vector<32x128xf32>, vector<2x128xf32> -> vector<2x128xf32>
    %688 = vector.broadcast %18 : vector<1x128xf32> to vector<2x128xf32>
    %689 = arith.addf %687, %688 : vector<2x128xf32>
    %cst_134 = arith.constant dense<0.000000e+00> : vector<2x128xf32>
    %690 = tpu.matmul %625, %17, %cst_134 {dimension_numbers = #tpu.dot_dimension_numbers<[1], [0], [0], [1], [0, 0, 1, 1], [], []>} : vector<2x32xf32>, vector<32x128xf32>, vector<2x128xf32> -> vector<2x128xf32>
    %691 = arith.addf %689, %690 : vector<2x128xf32>
    %692 = vector.extract_strided_slice %691 {offsets = [0, 0], sizes = [2, 32], strides = [1, 1]} : vector<2x128xf32> to vector<2x32xf32>
    %693 = arith.negf %692 : vector<2x32xf32>
    %694 = math.exp %693 : vector<2x32xf32>
    %cst_135 = arith.constant 1.000000e+00 : f32
    %695 = vector.broadcast %cst_135 : f32 to vector<2x32xf32>
    %696 = arith.addf %695, %694 : vector<2x32xf32>
    %697 = arith.divf %695, %696 : vector<2x32xf32>
    %698 = vector.extract_strided_slice %691 {offsets = [0, 32], sizes = [2, 32], strides = [1, 1]} : vector<2x128xf32> to vector<2x32xf32>
    %699 = arith.negf %698 : vector<2x32xf32>
    %700 = math.exp %699 : vector<2x32xf32>
    %cst_136 = arith.constant 1.000000e+00 : f32
    %701 = vector.broadcast %cst_136 : f32 to vector<2x32xf32>
    %702 = arith.addf %701, %700 : vector<2x32xf32>
    %703 = arith.divf %701, %702 : vector<2x32xf32>
    %704 = vector.extract_strided_slice %691 {offsets = [0, 64], sizes = [2, 32], strides = [1, 1]} : vector<2x128xf32> to vector<2x32xf32>
    %705 = math.tanh %704 : vector<2x32xf32>
    %706 = vector.extract_strided_slice %691 {offsets = [0, 96], sizes = [2, 32], strides = [1, 1]} : vector<2x128xf32> to vector<2x32xf32>
    %707 = arith.negf %706 : vector<2x32xf32>
    %708 = math.exp %707 : vector<2x32xf32>
    %cst_137 = arith.constant 1.000000e+00 : f32
    %709 = vector.broadcast %cst_137 : f32 to vector<2x32xf32>
    %710 = arith.addf %709, %708 : vector<2x32xf32>
    %711 = arith.divf %709, %710 : vector<2x32xf32>
    %712 = arith.mulf %703, %623 : vector<2x32xf32>
    %713 = arith.mulf %697, %705 : vector<2x32xf32>
    %714 = arith.addf %712, %713 : vector<2x32xf32>
    %715 = math.tanh %714 : vector<2x32xf32>
    %716 = arith.mulf %711, %715 : vector<2x32xf32>
    %717 = vector.extract_strided_slice %19 {offsets = [224, 0], sizes = [32, 10], strides = [1, 1]} : vector<256x10xf32> to vector<32x10xf32>
    %cst_138 = arith.constant dense<0.000000e+00> : vector<2x10xf32>
    %718 = tpu.matmul %716, %717, %cst_138 {dimension_numbers = #tpu.dot_dimension_numbers<[1], [0], [0], [1], [0, 0, 1, 1], [], []>} : vector<2x32xf32>, vector<32x10xf32>, vector<2x10xf32> -> vector<2x10xf32>
    %719 = arith.addf %628, %718 : vector<2x10xf32>
    %c0_139 = arith.constant 0 : index
    %c0_140 = arith.constant 0 : index
    %720 = vector.load %arg12[%c0_139, %c0_140] : memref<2x10xf32, #tpu.memory_space<vmem>>, vector<2x10xf32>
    tpu.vector_store %arg12[%c0_139, %c0_140], %719 {strides = array<i32>} : memref<2x10xf32, #tpu.memory_space<vmem>>, vector<2x10xf32>,
    return
  }
}

</mosaic_0001>

<bundles_post_ra>
// kernel: model_forward.1
= control target key start
LH: loop header
LB: loop body
LE: loop exit
PB: predicated region body
PF: predicated region fallthrough
CT: control target
= control target key end

     0   :  { %v5591_v2 = vmov 0   ;;  %s6449_s0 = inlined_call_operand.vmem [shape: s32[16,1], index: 0, kind: input, shape index: {}]   ;;  %s6450_s1 = inlined_call_operand.vmem [shape: f32[128,128], index: 1, kind: input, shape index: {}]   ;;  %s6451_s2 = inlined_call_operand.vmem [shape: f32[32,128], index: 2, kind: input, shape index: {}]   ;;  %s6452_s3 = inlined_call_operand.vmem [shape: f32[1,128], index: 3, kind: input, shape index: {}]   ;;  %s6453_s4 = inlined_call_operand.vmem [shape: f32[32,128], index: 4, kind: input, shape index: {}]   ;;  %s6454_s5 = inlined_call_operand.vmem [shape: f32[32,128], index: 5, kind: input, shape index: {}]   ;;  %s6455_s6 = inlined_call_operand.vmem [shape: f32[1,128], index: 6, kind: input, shape index: {}]   ;;  %s6456_s7 = inlined_call_operand.vmem [shape: f32[32,128], index: 7, kind: input, shape index: {}]   ;;  %s6457_s8 = inlined_call_operand.vmem [shape: f32[32,128], index: 8, kind: input, shape index: {}]   ;;  %s6458_s9 = inlined_call_operand.vmem [shape: f32[1,128], index: 9, kind: input, shape index: {}]   ;;  %s6459_s10 = inlined_call_operand.vmem [shape: f32[256,10], index: 10, kind: input, shape index: {}]   ;;  %s6460_s11 = inlined_call_operand.vmem [shape: f32[1,10], index: 11, kind: input, shape index: {}]   ;;  %s6461_s12 = inlined_call_operand.hbm [shape: f32[2,10], index: 12, kind: output, shape index: {}]  }
   0x1   :  { %v42_v0 = vld [vmem:[%s6449_s0] sm:$0xff]  ;;  %5372 = vset.pattern.permute.xlu0 %v5591_v2  ;;  %v57_v3 = vld [vmem:[%s6450_s1 + $0x8] sm:$0xff]  ;;  %v58_v4 = vld [vmem:[%s6450_s1 + $0x10] sm:$0xff] }
   0x2   :  { %v56_v1 = vld [vmem:[%s6450_s1] sm:$0xff]  ;;  %v59_v5 = vld [vmem:[%s6450_s1 + $0x18] sm:$0xff]  ;;  %47 = vperm.xlu0 %5372, %v42_v0   ;;  %v43_v8 = vld [vmem:[%s6449_s0 + $0x8] sm:$0xff] }
   0x3   :  { %v5004_v6 = vpack.c.bf16 %v57_v3, %v56_v1  ;;  %v5008_v7 = vpack.c.bf16 %v59_v5, %v58_v4  ;;  %v60_v9 = vld [vmem:[%s6450_s1 + $0x20] sm:$0xff]  ;;  %v61_v10 = vld [vmem:[%s6450_s1 + $0x28] sm:$0xff] }
   0x4   :  { %v5012_v11 = vpack.c.bf16 %v61_v10, %v60_v9 }
   0x5   :  { %5005 = vmatprep.subr.bf16.mxu0 %v5004_v6 }
   0x6   :  { %5007 = vmatpush3.bf16.msra.mxu0 %v5004_v6  ;;  %50 = vperm.xlu0 %5372, %v43_v8  }
   0x7   :  { %5009 = vmatprep.subr.bf16.mxu0 %v5008_v7 }
   0x8   :  { %17 = vsyncpa [#allocation3], 0  ;;  %v62_v12 = vld [vmem:[%s6450_s1 + $0x30] sm:$0xff]  ;;  %v63_v13 = vld [vmem:[%s6450_s1 + $0x38] sm:$0xff]  ;;  %v44_v27 = vlaneseq  ;;  %v5592_v30 = vmov 1.0   ;;  %v5594_v47 = vmov 0.0|0.0  }
   0x9   :  { %v5016_v14 = vpack.c.bf16 %v63_v13, %v62_v12  ;;  %v64_v15 = vld [vmem:[%s6450_s1 + $0x40] sm:$0xff]  ;;  %v65_v16 = vld [vmem:[%s6450_s1 + $0x48] sm:$0xff]  ;;  %v66_v18 = vld [vmem:[%s6450_s1 + $0x50] sm:$0xff]  ;;  %5036 = vmatprep.subr.bf16.mxu1 %v5594_v47  ;;  %vm5595_vm2 = vmmov 0   ;;  %v5596_v50 = vmov 0.0   ;;  %s5598_s28 = smov 32  }
   0xa   :  { %5011 = vmatpush3.bf16.msra.mxu0 %v5008_v7  ;;  %v5020_v17 = vpack.c.bf16 %v65_v16, %v64_v15  ;;  %v67_v19 = vld [vmem:[%s6450_s1 + $0x58] sm:$0xff]  ;;  %v68_v21 = vld [vmem:[%s6450_s1 + $0x60] sm:$0xff]  ;;  %v69_v22 = vld [vmem:[%s6450_s1 + $0x68] sm:$0xff]  ;;  %v45_v28 = vand.u32 127, %v44_v27  ;;  %4517 = vmatprep.mubr.msk.f32.mxu1 %vm5595_vm2, %v5596_v50  ;;  %vm236_vm3 = vcmask 261120   ;;  %vm4140_vm4 = vcmask 74752  }
   0xb   :  { %5013 = vmatprep.subr.bf16.mxu0 %v5012_v11  ;;  %v5024_v20 = vpack.c.bf16 %v67_v19, %v66_v18  ;;  %v5028_v23 = vpack.c.bf16 %v69_v22, %v68_v21  ;;  %v70_v24 = vld [vmem:[%s6450_s1 + $0x70] sm:$0xff]  ;;  %v71_v25 = vld [vmem:[%s6450_s1 + $0x78] sm:$0xff]  ;;  %v4156_v32 = vld [vmem:[%s6452_s3] ss:$0 sm:$0xff]  ;;  %s5593_s1 = smov 64  }
   0xc   :  { %v5032_v26 = vpack.c.bf16 %v71_v25, %v70_v24  ;;  %v158_v44 = vld [vmem:[%s6453_s4] sm:$0xff]  ;;  %v159_v45 = vld [vmem:[%s6453_s4 + $0x8] sm:$0xff]  ;;  %v160_v46 = vld [vmem:[%s6453_s4 + $0x10] sm:$0xff] }
   0xd   :  { %v5742_v48 = vpack.c.bf16 %v159_v45, %v158_v44  ;;  %v161_v49 = vld [vmem:[%s6453_s4 + $0x18] sm:$0xff]  ;;  %s5597_s4 = smov 96   ;;  %v5773_v56 = vld [vmem:[%s6455_s6] ss:$0 sm:$0xff]  ;;  %v168_v4 = vld [vmem:[%s6456_s7 + $0x8] sm:$0xff] }
   0xe   :  { %5015 = vmatpush3.bf16.msra.mxu0 %v5012_v11  ;;  %v5753_v51 = vpack.c.bf16 %v161_v49, %v160_v46  ;;  %v167_v3 = vld [vmem:[%s6456_s7] sm:$0xff]  ;;  %v169_v5 = vld [vmem:[%s6456_s7 + $0x10] sm:$0xff]  ;;  %v170_v7 = vld [vmem:[%s6456_s7 + $0x18] sm:$0xff] }
   0xf   :  { %5017 = vmatprep.subr.bf16.mxu0 %v5016_v14  ;;  %5038 = vmatpush3.bf16.msra.mxu1 %v5742_v48  ;;  %v5789_v6 = vpack.c.bf16 %v168_v4, %v167_v3  ;;  %v5795_v8 = vpack.c.bf16 %v170_v7, %v169_v5  ;;  %v5811_v13 = vld [vmem:[%s6458_s9] ss:$0 sm:$0xff]  ;;  %v177_v25 = vld [vmem:[%s6459_s10 + $0x8] sm:$0xff] }
  0x10   :  { %5039 = vmatprep.subr.bf16.mxu1 %v5594_v47  ;;  %v176_v24 = vld [vmem:[%s6459_s10] sm:$0xff]  ;;  %v163_v5 = vld [vmem:[%s6454_s5 + $0x8] sm:$0xff] }
  0x11   :  { %v5049_v27 = vpack.c.bf16 %v177_v25, %v176_v24  ;;  %v162_v4 = vld [vmem:[%s6454_s5] sm:$0xff] }
  0x12   :  { %5019 = vmatpush3.bf16.msra.mxu0 %v5016_v14  ;;  %v5884_v7 = vpack.c.bf16 %v163_v5, %v162_v4 }
  0x13   :  { %5021 = vmatprep.subr.bf16.mxu0 %v5020_v17  ;;  %5041 = vmatpush3.bf16.msra.mxu1 %v5753_v51 }
  0x14   :  { %5042 = vmatprep.subr.bf16.mxu1 %v5594_v47 }
  0x16   :  { %5023 = vmatpush3.bf16.msra.mxu0 %v5020_v17 }
  0x17   :  { %5025 = vmatprep.subr.bf16.mxu0 %v5024_v20 }
  0x1a   :  { %5027 = vmatpush3.bf16.msra.mxu0 %v5024_v20 }
  0x1b   :  { %5029 = vmatprep.subr.bf16.mxu0 %v5028_v23 }
  0x1e   :  { %5031 = vmatpush3.bf16.msra.mxu0 %v5028_v23 }
  0x1f   :  { %5033 = vmatprep.subr.bf16.mxu0 %v5032_v26 }
  0x22   :  { %5035 = vmatpush3.bf16.msra.mxu0 %v5032_v26  ;;  %v178_v26 = vld [vmem:[%s6459_s10 + $0x10] sm:$0xff] }
  0x23   :  { %5060 = vmatprep.subr.bf16.mxu0 %v5594_v47 }
  0x81   :  { %v48_v29 = vpop.permute.xlu0 %47 }
  0x82   :  { %vm52_vm0 = vcmp.eq.s32.totalorder %v45_v28, %v48_v29 }
  0x83   :  { %4506 = vmatprep.mubr.msk.f32.mxu0 %vm52_vm0, %v5592_v30 }
  0x85   :  { %v51_v31 = vpop.permute.xlu0 %50 }
  0x86   :  { %vm53_vm1 = vcmp.eq.s32.totalorder %v45_v28, %v51_v31  ;;  %v179_v28 = vld [vmem:[%s6459_s10 + $0x18] sm:$0xff] }
  0x87   :  { %4507 = vmatmul.mubr.msk.f32.vlgmr.msra.gmra.mrb[0].mxu0 %vm53_vm1, %v5592_v30  ;;  %v5052_v29 = vpack.c.bf16 %v179_v28, %v178_v26 }
  0x88   :  { %4561 = vmatprep.mubr.msk.f32.mxu0 %vm5595_vm2, %v5596_v50  ;;  %5062 = vmatpush3.bf16.msra.mxu0 %v5742_v48 }
  0x89   :  { %5063 = vmatprep.subr.bf16.mxu0 %v5594_v47 }
  0x8c   :  { %5065 = vmatpush3.bf16.msra.mxu0 %v5753_v51 }
  0x8d   :  { %5066 = vmatprep.subr.bf16.mxu0 %v5594_v47 }
 0x15a   :  { %v4508_v33 = vpop.f32.mrb[0].mxu0 }
 0x15b   :  { %v5722_v34 = vadd.f32 %v4508_v33, %v4156_v32  ;;  %v145_v35 = vpop.f32.mrb[1].mxu0 }
 0x15c   :  { %v5724_v36 = vadd.f32 %v4156_v32, %v145_v35  ;;  %v154_v35 = vld [vmem:[%s6451_s2] sm:$0xff] }
 0x15e   :  { %5373 = vtanh.f32 %v5724_v36  ;;  %v4159_v38 = vmul.f32 -1.442695, %v5724_v36 }
 0x160   :  { %5375 = vpow2.f32 %v4159_v38 }
 0x168   :  { %v5374_v37 = vpop.eup %5373 }
 0x169   :  { %217 = vrot.lane.b32.xlu1 %v5374_v37, %s5593_s1  ;;  %v155_v37 = vld [vmem:[%s6451_s2 + $0x8] sm:$0xff] }
 0x16a   :  { %v5376_v39 = vpop.eup %5375  ;;  %v5842_v38 = vpack.c.bf16 %v155_v37, %v154_v35 }
 0x16b   :  { %v212_v40 = vadd.f32 1.0, %v5376_v39  ;;  %v156_v39 = vld [vmem:[%s6451_s2 + $0x10] sm:$0xff] }
 0x16d   :  { %5377 = vrcp.f32 %v212_v40  ;;  %v157_v40 = vld [vmem:[%s6451_s2 + $0x18] sm:$0xff] }
 0x177   :  { %v5378_v41 = vpop.eup %5377 }
 0x1db   :  { %v218_v42 = vpop.permute.xlu1 %217 }
 0x1dc   :  { %v5729_v43 = vmul.f32 %v5378_v41, %v218_v42  ;;  %v5855_v42 = vpack.c.bf16 %v157_v40, %v156_v39 }
 0x1de   :  { %5379 = vtanh.f32 %v5729_v43  ;;  %v590_v33 = vrot.slane %v5729_v43, 6 }
 0x1e8   :  { %v5380_v52 = vpop.eup %5379 }
 0x1e9   :  { %223 = vrot.lane.b32.xlu1 %v5380_v52, %s5597_s4 }
 0x25b   :  { %v224_v53 = vpop.permute.xlu1 %223 }
 0x25c   :  { %v226_v54 = vmul.f32 %v5378_v41, %v224_v53 }
 0x25e   :  { %234 = vrot.lane.b32.xlu0 %v226_v54, %s5598_s28 }
 0x2d0   :  { %v5764_v55 = vpop.permute.xlu0 %234 }
 0x2d1   :  { %4518 = vmatmul.mubr.msk.f32.vlgmr.msra.gmra.mrb[0].mxu1 %vm236_vm3, %v5764_v55 }
 0x2d2   :  { %4528 = vmatprep.mubr.msk.f32.mxu1 %vm5595_vm2, %v5596_v50  ;;  %5044 = vmatpush3.bf16.msra.mxu1 %v5789_v6 }
 0x2d3   :  { %5045 = vmatprep.subr.bf16.mxu1 %v5594_v47 }
 0x2d6   :  { %5047 = vmatpush3.bf16.msra.mxu1 %v5795_v8 }
 0x2d7   :  { %5048 = vmatprep.subr.bf16.mxu1 %v5594_v47 }
 0x3a4   :  { %v305_v57 = vpop.f32.mrb[0].mxu1 }
 0x3a5   :  { %v306_v58 = vadd.f32 %v5773_v56, %v305_v57  ;;  %v4519_v59 = vpop.f32.mrb[1].mxu1 }
 0x3a7   :  { %5381 = vtanh.f32 %v306_v58  ;;  %v4162_v61 = vmul.f32 -1.442695, %v306_v58 }
 0x3a9   :  { %5383 = vpow2.f32 %v4162_v61 }
 0x3b1   :  { %v5382_v60 = vpop.eup %5381 }
 0x3b2   :  { %317 = vrot.lane.b32.xlu1 %v5382_v60, %s5593_s1 }
 0x3b3   :  { %v5384_v62 = vpop.eup %5383 }
 0x3b4   :  { %v312_v63 = vadd.f32 1.0, %v5384_v62 }
 0x3b6   :  { %5385 = vrcp.f32 %v312_v63 }
 0x3c0   :  { %v5386_v0 = vpop.eup %5385 }
 0x424   :  { %v318_v1 = vpop.permute.xlu1 %317 }
 0x425   :  { %v5777_v2 = vmul.f32 %v5386_v0, %v318_v1 }
 0x427   :  { %5387 = vtanh.f32 %v5777_v2 }
 0x431   :  { %v5388_v9 = vpop.eup %5387 }
 0x432   :  { %323 = vrot.lane.b32.xlu0 %v5388_v9, %s5597_s4  ;;  %v164_v9 = vld [vmem:[%s6454_s5 + $0x10] sm:$0xff] }
 0x4a4   :  { %v324_v10 = vpop.permute.xlu0 %323 }
 0x4a5   :  { %v326_v11 = vmul.f32 %v5386_v0, %v324_v10  ;;  %v165_v10 = vld [vmem:[%s6454_s5 + $0x18] sm:$0xff] }
 0x4a7   :  { %334 = vrot.lane.b32.xlu1 %v326_v11, %s5598_s28 }
 0x519   :  { %v5802_v12 = vpop.permute.xlu1 %334 }
 0x51a   :  { %4529 = vmatmul.mubr.msk.f32.vlgmr.msra.gmra.mrb[2].mxu1 %vm236_vm3, %v5802_v12 }
 0x51b   :  { %4539 = vmatprep.mubr.msk.f32.mxu1 %vm5595_vm2, %v5596_v50  ;;  %5050 = vmatpush3.bf16.msra.mxu1 %v5049_v27 }
 0x51c   :  { %5051 = vmatprep.subr.bf16.mxu1 %v5594_v47 }
 0x51f   :  { %5053 = vmatpush3.bf16.msra.mxu1 %v5052_v29 }
 0x520   :  { %5054 = vmatprep.subr.bf16.mxu1 %v5594_v47 }
 0x5ed   :  { %v404_v14 = vpop.f32.mrb[2].mxu1 }
 0x5ee   :  { %v405_v15 = vadd.f32 %v5811_v13, %v404_v14  ;;  %v4530_v16 = vpop.f32.mrb[3].mxu1  ;;  %v5894_v14 = vpack.c.bf16 %v165_v10, %v164_v9 }
 0x5f0   :  { %5389 = vtanh.f32 %v405_v15  ;;  %v4165_v18 = vmul.f32 -1.442695, %v405_v15 }
 0x5f2   :  { %5391 = vpow2.f32 %v4165_v18 }
 0x5fa   :  { %v5390_v17 = vpop.eup %5389 }
 0x5fb   :  { %416 = vrot.lane.b32.xlu0 %v5390_v17, %s5593_s1 }
 0x5fc   :  { %v5392_v19 = vpop.eup %5391 }
 0x5fd   :  { %v411_v20 = vadd.f32 1.0, %v5392_v19 }
 0x5ff   :  { %5393 = vrcp.f32 %v411_v20 }
 0x609   :  { %v5394_v21 = vpop.eup %5393 }
 0x66d   :  { %v417_v22 = vpop.permute.xlu0 %416 }
 0x66e   :  { %v5815_v23 = vmul.f32 %v5394_v21, %v417_v22 }
 0x670   :  { %5395 = vtanh.f32 %v5815_v23 }
 0x67a   :  { %v5396_v30 = vpop.eup %5395 }
 0x67b   :  { %422 = vrot.lane.b32.xlu1 %v5396_v30, %s5597_s4 }
 0x6ed   :  { %v423_v31 = vpop.permute.xlu1 %422 }
 0x6ee   :  { %v425_v32 = vmul.f32 %v5394_v21, %v423_v31 }
 0x6f0   :  { %427 = vrot.lane.b32.xlu0 %v425_v32, %s5598_s28 }
 0x6f4   :  { %591 = vrot.lane.b32.xlu0 %v590_v33, %s5598_s28 }
 0x762   :  { %v5850_v41 = vpop.permute.xlu0 %427 }
 0x763   :  { %4540 = vmatmul.mubr.msk.f32.vlgmr.msra.gmra.mrb[4].mxu1 %vm236_vm3, %v5850_v41 }
 0x764   :  { %5056 = vmatpush3.bf16.msra.mxu1 %v5842_v38  ;;  %4550 = vmatprep.mubr.msk.f32.mxu1 %vm5595_vm2, %v5596_v50 }
 0x765   :  { %5057 = vmatprep.subr.bf16.mxu1 %v5594_v47 }
 0x766   :  { %v592_v59 = vpop.permute.xlu0 %591 }
 0x768   :  { %5059 = vmatpush3.bf16.msra.mxu1 %v5855_v42 }
 0x769   :  { %5072 = vmatprep.subr.bf16.mxu1 %v5594_v47 }
 0x76b   :  { %4551 = vmatmul.mubr.msk.f32.vlgmr.msra.gmra.mrb[6].mxu1 %vm236_vm3, %v5764_v55 }
 0x76c   :  { %5074 = vmatpush3.bf16.msra.mxu1 %v5789_v6  ;;  %4583 = vmatprep.mubr.msk.f32.mxu1 %vm5595_vm2, %v5596_v50 }
 0x76d   :  { %5075 = vmatprep.subr.bf16.mxu1 %v5594_v47 }
 0x770   :  { %5077 = vmatpush3.bf16.msra.mxu1 %v5795_v8 }
 0x771   :  { %5078 = vmatprep.subr.bf16.mxu1 %v5594_v47 }
 0x83e   :  { %v574_v43 = vpop.f32.mrb[6].mxu1 }
 0x83f   :  { %v579_v44 = vrot.slane %v574_v43, 6  ;;  %v4552_v45 = vpop.f32.mrb[7].mxu1 }
 0x841   :  { %v581_v46 = vadd.f32 %v579_v44, %v5724_v36 }
 0x843   :  { %5397 = vtanh.f32 %v581_v46  ;;  %v4169_v52 = vmul.f32 -1.442695, %v581_v46 }
 0x845   :  { %5399 = vpow2.f32 %v4169_v52 }
 0x84d   :  { %v5398_v49 = vpop.eup %5397 }
 0x84e   :  { %596 = vrot.lane.b32.xlu1 %v5398_v49, %s5593_s1 }
 0x84f   :  { %v5400_v53 = vpop.eup %5399 }
 0x850   :  { %v585_v54 = vadd.f32 1.0, %v5400_v53 }
 0x852   :  { %5401 = vrcp.f32 %v585_v54 }
 0x85c   :  { %v5402_v55 = vpop.eup %5401 }
 0x85d   :  { %v594_v60 = vmul.f32 %v5402_v55, %v592_v59 }
 0x8c0   :  { %v597_v57 = vpop.permute.xlu1 %596 }
 0x8c1   :  { %v599_v58 = vmul.f32 %v5402_v55, %v597_v57 }
 0x8c3   :  { %601 = vrot.lane.b32.xlu1 %v599_v58, %s5598_s28 }
 0x935   :  { %v602_v61 = vpop.permute.xlu1 %601 }
 0x936   :  { %v5873_v62 = vadd.f32 %v602_v61, %v594_v60  ;;  %v171_v60 = vld [vmem:[%s6457_s8] sm:$0xff]  ;;  %v172_v61 = vld [vmem:[%s6457_s8 + $0x8] sm:$0xff] }
 0x938   :  { %5403 = vtanh.f32 %v5873_v62  ;;  %v1118_v37 = vrot.slane %v5873_v62, 6 }
 0x942   :  { %v5404_v63 = vpop.eup %5403 }
 0x943   :  { %607 = vrot.lane.b32.xlu0 %v5404_v63, %s5593_s1  ;;  %v5941_v63 = vpack.c.bf16 %v172_v61, %v171_v60  ;;  %v180_v61 = vld [vmem:[%s6459_s10 + $0x20] sm:$0xff] }
 0x9b5   :  { %v608_v0 = vpop.permute.xlu0 %607 }
 0x9b6   :  { %v610_v1 = vmul.f32 %v5402_v55, %v608_v0  ;;  %v173_v0 = vld [vmem:[%s6457_s8 + $0x10] sm:$0xff] }
 0x9b8   :  { %v612_v3 = vrot.slane %v610_v1, 2  ;;  %v174_v1 = vld [vmem:[%s6457_s8 + $0x18] sm:$0xff] }
 0x9b9   :  { %v5956_v4 = vpack.c.bf16 %v174_v1, %v173_v0  ;;  %v183_v1 = vld [vmem:[%s6459_s10 + $0x38] sm:$0xff] }
 0x9ba   :  { %613 = vrot.lane.b32.xlu1 %v612_v3, %s5598_s28 }
 0xa2c   :  { %v614_v11 = vpop.permute.xlu1 %613 }
 0xa2d   :  { %4562 = vmatmul.mubr.msk.f32.vlgmr.msra.gmra.mrb[2].mxu0 %vm236_vm3, %v614_v11 }
 0xa2e   :  { %5068 = vmatpush3.bf16.msra.mxu0 %v5884_v7  ;;  %4572 = vmatprep.mubr.msk.f32.mxu0 %vm5595_vm2, %v5596_v50 }
 0xa2f   :  { %5069 = vmatprep.subr.bf16.mxu0 %v5594_v47 }
 0xa32   :  { %5071 = vmatpush3.bf16.msra.mxu0 %v5894_v14 }
 0xa33   :  { %5090 = vmatprep.subr.bf16.mxu0 %v5594_v47 }
 0xa35   :  { %4573 = vmatmul.mubr.msk.f32.vlgmr.msra.gmra.mrb[2].mxu0 %vm236_vm3, %v5802_v12 }
 0xa36   :  { %5092 = vmatpush3.bf16.msra.mxu0 %v5842_v38  ;;  %4616 = vmatprep.mubr.msk.f32.mxu0 %vm5595_vm2, %v5596_v50 }
 0xa37   :  { %5093 = vmatprep.subr.bf16.mxu0 %v5594_v47 }
 0xa3a   :  { %5095 = vmatpush3.bf16.msra.mxu0 %v5855_v42 }
 0xa3b   :  { %5096 = vmatprep.subr.bf16.mxu0 %v5594_v47 }
 0xa3d   :  { %4617 = vmatmul.mubr.msk.f32.vlgmr.msra.gmra.mrb[4].mxu0 %vm236_vm3, %v614_v11 }
 0xa3e   :  { %5098 = vmatpush3.bf16.msra.mxu0 %v5742_v48  ;;  %4627 = vmatprep.mubr.msk.f32.mxu0 %vm5595_vm2, %v5596_v50 }
 0xa3f   :  { %5099 = vmatprep.subr.bf16.mxu0 %v5594_v47 }
 0xa42   :  { %5101 = vmatpush3.bf16.msra.mxu0 %v5753_v51 }
 0xa43   :  { %5102 = vmatprep.subr.bf16.mxu0 %v5594_v47 }
 0xb08   :  { %v753_v12 = vpop.f32.mrb[2].mxu0 }
 0xb09   :  { %v5307_v15 = vadd.f32 %v5773_v56, %v753_v12  ;;  %v4574_v16 = vpop.f32.mrb[3].mxu0 }
 0xb0b   :  { %5405 = vtanh.f32 %v5307_v15  ;;  %v4172_v25 = vmul.f32 -1.442695, %v5307_v15 }
 0xb10   :  { %v1102_v17 = vpop.f32.mrb[4].mxu0 }
 0xb11   :  { %v1107_v18 = vrot.slane %v1102_v17, 4  ;;  %v4618_v19 = vpop.f32.mrb[5].mxu0 }
 0xb13   :  { %v1109_v20 = vadd.f32 %v1107_v18, %v5724_v36 }
 0xb15   :  { %v5406_v21 = vpop.eup %5405  ;;  %5407 = vtanh.f32 %v1109_v20  ;;  %v4178_v24 = vmul.f32 -1.442695, %v1109_v20 }
 0xb16   :  { %771 = vrot.lane.b32.xlu1 %v5406_v21, %s5593_s1 }
 0xb17   :  { %5409 = vpow2.f32 %v4178_v24 }
 0xb18   :  { %5411 = vpow2.f32 %v4172_v25 }
 0xb1a   :  { %766 = vrot.lane.b32.xlu1 %v5777_v2, %s5598_s28 }
 0xb1f   :  { %v5408_v22 = vpop.eup %5407 }
 0xb20   :  { %1122 = vrot.lane.b32.xlu0 %v5408_v22, %s5593_s1 }
 0xb21   :  { %v5410_v26 = vpop.eup %5409 }
 0xb22   :  { %v1113_v27 = vadd.f32 1.0, %v5410_v26  ;;  %v5412_v28 = vpop.eup %5411 }
 0xb23   :  { %v761_v29 = vadd.f32 1.0, %v5412_v28 }
 0xb24   :  { %5413 = vrcp.f32 %v1113_v27 }
 0xb25   :  { %5415 = vrcp.f32 %v761_v29 }
 0xb2e   :  { %v5414_v30 = vpop.eup %5413 }
 0xb2f   :  { %v5416_v2 = vpop.eup %5415  ;;  %v1120_v39 = vmul.f32 %v5414_v30, %v1118_v37 }
 0xb88   :  { %v772_v33 = vpop.permute.xlu1 %771 }
 0xb89   :  { %v774_v35 = vmul.f32 %v5416_v2, %v772_v33 }
 0xb8c   :  { %v767_v40 = vpop.permute.xlu1 %766 }
 0xb8d   :  { %v769_v45 = vmul.f32 %v5416_v2, %v767_v40 }
 0xb92   :  { %v1123_v31 = vpop.permute.xlu0 %1122 }
 0xb93   :  { %v1125_v32 = vmul.f32 %v5414_v30, %v1123_v31 }
 0xb95   :  { %1127 = vrot.lane.b32.xlu0 %v1125_v32, %s5598_s28 }
 0xb99   :  { %776 = vrot.lane.b32.xlu0 %v774_v35, %s5598_s28 }
 0xc07   :  { %v1128_v43 = vpop.permute.xlu0 %1127 }
 0xc08   :  { %v5925_v44 = vadd.f32 %v1128_v43, %v1120_v39 }
 0xc0a   :  { %5417 = vtanh.f32 %v5925_v44 }
 0xc0b   :  { %v777_v46 = vpop.permute.xlu0 %776 }
 0xc0c   :  { %v5928_v49 = vadd.f32 %v777_v46, %v769_v45 }
 0xc0e   :  { %5419 = vtanh.f32 %v5928_v49 }
 0xc14   :  { %v5418_v52 = vpop.eup %5417 }
 0xc15   :  { %1133 = vrot.lane.b32.xlu1 %v5418_v52, %s5593_s1 }
 0xc18   :  { %v5420_v53 = vpop.eup %5419 }
 0xc19   :  { %782 = vrot.lane.b32.xlu0 %v5420_v53, %s5593_s1 }
 0xc87   :  { %v1134_v54 = vpop.permute.xlu1 %1133 }
 0xc88   :  { %v1136_v55 = vmul.f32 %v5414_v30, %v1134_v54  ;;  %v1636_v54 = vrot.slane %v5925_v44, 6  ;;  %v182_v44 = vld [vmem:[%s6459_s10 + $0x30] sm:$0xff] }
 0xc8a   :  { %v1138_v57 = vrot.slane %v1136_v55, 4 }
 0xc8b   :  { %v783_v58 = vpop.permute.xlu0 %782 }
 0xc8c   :  { %v785_v59 = vmul.f32 %v5416_v2, %v783_v58  ;;  %1139 = vrot.lane.b32.xlu1 %v1138_v57, %s5598_s28 }
 0xc8e   :  { %787 = vrot.lane.b32.xlu0 %v785_v59, %s5598_s28 }
 0xcfe   :  { %v1140_v62 = vpop.permute.xlu1 %1139 }
 0xcff   :  { %4628 = vmatmul.mubr.msk.f32.vlgmr.msra.gmra.mrb[6].mxu0 %vm236_vm3, %v1140_v62 }
 0xd00   :  { %5104 = vmatpush3.bf16.msra.mxu0 %v5884_v7  ;;  %v788_v3 = vpop.permute.xlu0 %787  ;;  %4638 = vmatprep.mubr.msk.f32.mxu0 %vm5595_vm2, %v5596_v50 }
 0xd01   :  { %4584 = vmatmul.mubr.msk.f32.vlgmr.msra.gmra.mrb[8].mxu1 %vm236_vm3, %v788_v3  ;;  %5105 = vmatprep.subr.bf16.mxu0 %v5594_v47 }
 0xd02   :  { %5080 = vmatpush3.bf16.msra.mxu1 %v5941_v63  ;;  %4594 = vmatprep.mubr.msk.f32.mxu1 %vm5595_vm2, %v5596_v50 }
 0xd03   :  { %5081 = vmatprep.subr.bf16.mxu1 %v5594_v47 }
 0xd04   :  { %5107 = vmatpush3.bf16.msra.mxu0 %v5894_v14 }
 0xd05   :  { %5126 = vmatprep.subr.bf16.mxu0 %v5594_v47 }
 0xd06   :  { %5083 = vmatpush3.bf16.msra.mxu1 %v5956_v4 }
 0xd07   :  { %4639 = vmatmul.mubr.msk.f32.vlgmr.msra.gmra.mrb[6].mxu0 %vm236_vm3, %v788_v3  ;;  %5084 = vmatprep.subr.bf16.mxu1 %v5594_v47  ;;  %v5088_v3 = vpack.c.bf16 %v183_v1, %v182_v44 }
 0xd08   :  { %5128 = vmatpush3.bf16.msra.mxu0 %v5842_v38  ;;  %4682 = vmatprep.mubr.msk.f32.mxu0 %vm5595_vm2, %v5596_v50 }
 0xd09   :  { %4595 = vmatmul.mubr.msk.f32.vlgmr.msra.gmra.mrb[8].mxu1 %vm236_vm3, %v5850_v41  ;;  %5129 = vmatprep.subr.bf16.mxu0 %v5594_v47 }
 0xd0a   :  { %4605 = vmatprep.mubr.msk.f32.mxu1 %vm5595_vm2, %v5596_v50 }
 0xd0c   :  { %5131 = vmatpush3.bf16.msra.mxu0 %v5855_v42 }
 0xd0d   :  { %5132 = vmatprep.subr.bf16.mxu0 %v5594_v47 }
 0xd0f   :  { %4683 = vmatmul.mubr.msk.f32.vlgmr.msra.gmra.mrb[8].mxu0 %vm236_vm3, %v1140_v62 }
 0xd10   :  { %5134 = vmatpush3.bf16.msra.mxu0 %v5742_v48  ;;  %4693 = vmatprep.mubr.msk.f32.mxu0 %vm5595_vm2, %v5596_v50 }
 0xd11   :  { %5135 = vmatprep.subr.bf16.mxu0 %v5594_v47 }
 0xd14   :  { %5137 = vmatpush3.bf16.msra.mxu0 %v5753_v51 }
 0xd15   :  { %5138 = vmatprep.subr.bf16.mxu0 %v5594_v47 }
 0xdda   :  { %v1279_v41 = vpop.f32.mrb[6].mxu0 }
 0xddb   :  { %v4640_v5 = vpop.f32.mrb[7].mxu0  ;;  %v5309_v12 = vadd.f32 %v5773_v56, %v1279_v41 }
 0xddc   :  { %v927_v9 = vpop.f32.mrb[8].mxu1 }
 0xddd   :  { %v5308_v10 = vadd.f32 %v5811_v13, %v927_v9  ;;  %v4596_v11 = vpop.f32.mrb[9].mxu1  ;;  %v4181_v24 = vmul.f32 -1.442695, %v5309_v12 }
 0xddf   :  { %5421 = vtanh.f32 %v5308_v10  ;;  %v4175_v22 = vmul.f32 -1.442695, %v5308_v10 }
 0xde0   :  { %5423 = vtanh.f32 %v5309_v12 }
 0xde2   :  { %v1620_v15 = vpop.f32.mrb[8].mxu0 }
 0xde3   :  { %v1625_v16 = vrot.slane %v1620_v15, 2  ;;  %v4684_v17 = vpop.f32.mrb[9].mxu0 }
 0xde5   :  { %v1627_v18 = vadd.f32 %v1625_v16, %v5724_v36 }
 0xde7   :  { %5425 = vtanh.f32 %v1627_v18  ;;  %v4187_v25 = vmul.f32 -1.442695, %v1627_v18 }
 0xde8   :  { %5427 = vpow2.f32 %v4175_v22 }
 0xde9   :  { %v5422_v19 = vpop.eup %5421  ;;  %5429 = vpow2.f32 %v4181_v24 }
 0xdea   :  { %945 = vrot.lane.b32.xlu1 %v5422_v19, %s5593_s1  ;;  %v5424_v20 = vpop.eup %5423  ;;  %5431 = vpow2.f32 %v4187_v25 }
 0xdee   :  { %1293 = vrot.lane.b32.xlu1 %v5424_v20, %s5593_s1 }
 0xdf1   :  { %v5426_v21 = vpop.eup %5425 }
 0xdf2   :  { %1640 = vrot.lane.b32.xlu0 %v5426_v21, %s5593_s1  ;;  %v5428_v36 = vpop.eup %5427 }
 0xdf3   :  { %v935_v26 = vadd.f32 1.0, %v5428_v36  ;;  %v5430_v27 = vpop.eup %5429 }
 0xdf4   :  { %v5432_v28 = vpop.eup %5431  ;;  %v1287_v29 = vadd.f32 1.0, %v5430_v27 }
 0xdf5   :  { %5433 = vrcp.f32 %v935_v26  ;;  %v1631_v30 = vadd.f32 1.0, %v5432_v28 }
 0xdf6   :  { %940 = vrot.lane.b32.xlu0 %v5815_v23, %s5598_s28  ;;  %5435 = vrcp.f32 %v1287_v29 }
 0xdf7   :  { %5437 = vrcp.f32 %v1631_v30 }
 0xdff   :  { %v5434_v31 = vpop.eup %5433 }
 0xe00   :  { %v5436_v23 = vpop.eup %5435 }
 0xe01   :  { %v5438_v37 = vpop.eup %5437  ;;  %v1291_v53 = vmul.f32 %v5436_v23, %v5928_v49  ;;  %v181_v49 = vld [vmem:[%s6459_s10 + $0x28] sm:$0xff] }
 0xe02   :  { %v1638_v58 = vmul.f32 %v5438_v37, %v1636_v54  ;;  %v5085_v0 = vpack.c.bf16 %v181_v49, %v180_v61 }
 0xe04   :  { %5086 = vmatpush3.bf16.msra.mxu1 %v5085_v0 }
 0xe05   :  { %5087 = vmatprep.subr.bf16.mxu1 %v5594_v47 }
 0xe08   :  { %5089 = vmatpush3.bf16.msra.mxu1 %v5088_v3 }
 0xe09   :  { %5108 = vmatprep.subr.bf16.mxu1 %v5594_v47 }
 0xe5c   :  { %v946_v32 = vpop.permute.xlu1 %945 }
 0xe5d   :  { %v948_v33 = vmul.f32 %v5434_v31, %v946_v32 }
 0xe5f   :  { %950 = vrot.lane.b32.xlu1 %v948_v33, %s5598_s28 }
 0xe60   :  { %v1294_v2 = vpop.permute.xlu1 %1293 }
 0xe61   :  { %v1296_v35 = vmul.f32 %v5436_v23, %v1294_v2 }
 0xe63   :  { %1298 = vrot.lane.b32.xlu1 %v1296_v35, %s5598_s28 }
 0xe64   :  { %v1641_v39 = vpop.permute.xlu0 %1640 }
 0xe65   :  { %v1643_v40 = vmul.f32 %v5438_v37, %v1641_v39 }
 0xe67   :  { %1645 = vrot.lane.b32.xlu0 %v1643_v40, %s5598_s28 }
 0xe68   :  { %v941_v43 = vpop.permute.xlu0 %940 }
 0xe69   :  { %v943_v45 = vmul.f32 %v5434_v31, %v941_v43 }
 0xed1   :  { %v951_v46 = vpop.permute.xlu1 %950 }
 0xed2   :  { %v5994_v52 = vadd.f32 %v951_v46, %v943_v45 }
 0xed4   :  { %5439 = vtanh.f32 %v5994_v52 }
 0xed5   :  { %v1299_v55 = vpop.permute.xlu1 %1298 }
 0xed6   :  { %v5999_v57 = vadd.f32 %v1299_v55, %v1291_v53 }
 0xed8   :  { %5441 = vtanh.f32 %v5999_v57 }
 0xed9   :  { %v1646_v59 = vpop.permute.xlu0 %1645 }
 0xeda   :  { %v6002_v60 = vadd.f32 %v1646_v59, %v1638_v58 }
 0xedc   :  { %5443 = vtanh.f32 %v6002_v60 }
 0xede   :  { %v5440_v62 = vpop.eup %5439 }
 0xedf   :  { %956 = vrot.lane.b32.xlu0 %v5440_v62, %s5593_s1 }
 0xee2   :  { %v5442_v41 = vpop.eup %5441 }
 0xee3   :  { %1304 = vrot.lane.b32.xlu0 %v5442_v41, %s5593_s1 }
 0xee6   :  { %v5444_v5 = vpop.eup %5443 }
 0xee7   :  { %1651 = vrot.lane.b32.xlu1 %v5444_v5, %s5593_s1 }
 0xf51   :  { %v957_v9 = vpop.permute.xlu0 %956 }
 0xf52   :  { %v959_v10 = vmul.f32 %v5434_v31, %v957_v9  ;;  %v2151_v9 = vrot.slane %v6002_v60, 6  ;;  %v186_v60 = vld [vmem:[%s6459_s10 + $0x50] sm:$0xff] }
 0xf54   :  { %961 = vrot.lane.b32.xlu1 %v959_v10, %s5598_s28 }
 0xf55   :  { %v1305_v11 = vpop.permute.xlu0 %1304 }
 0xf56   :  { %v1307_v12 = vmul.f32 %v5436_v23, %v1305_v11 }
 0xf58   :  { %1309 = vrot.lane.b32.xlu1 %v1307_v12, %s5598_s28 }
 0xf59   :  { %v1652_v15 = vpop.permute.xlu1 %1651 }
 0xf5a   :  { %v1654_v16 = vmul.f32 %v5438_v37, %v1652_v15 }
 0xf5c   :  { %v1656_v17 = vrot.slane %v1654_v16, 6 }
 0xf5e   :  { %1657 = vrot.lane.b32.xlu0 %v1656_v17, %s5598_s28  ;;  %v187_v17 = vld [vmem:[%s6459_s10 + $0x58] sm:$0xff] }
 0xfc6   :  { %v962_v18 = vpop.permute.xlu1 %961 }
 0xfc7   :  { %4606 = vmatmul.mubr.msk.f32.vlgmr.msra.gmra.mrb[4].mxu1 %vm236_vm3, %v962_v18 }
 0xfc8   :  { %5110 = vmatpush3.bf16.msra.mxu1 %v5789_v6  ;;  %4649 = vmatprep.mubr.msk.f32.mxu1 %vm5595_vm2, %v5596_v50 }
 0xfc9   :  { %5111 = vmatprep.subr.bf16.mxu1 %v5594_v47 }
 0xfca   :  { %v1310_v19 = vpop.permute.xlu1 %1309 }
 0xfcc   :  { %5113 = vmatpush3.bf16.msra.mxu1 %v5795_v8 }
 0xfcd   :  { %5114 = vmatprep.subr.bf16.mxu1 %v5594_v47 }
 0xfcf   :  { %4650 = vmatmul.mubr.msk.f32.vlgmr.msra.gmra.mrb[10].mxu1 %vm236_vm3, %v1310_v19 }
 0xfd0   :  { %v1658_v20 = vpop.permute.xlu0 %1657  ;;  %5116 = vmatpush3.bf16.msra.mxu1 %v5941_v63  ;;  %4660 = vmatprep.mubr.msk.f32.mxu1 %vm5595_vm2, %v5596_v50 }
 0xfd1   :  { %4694 = vmatmul.mubr.msk.f32.vlgmr.msra.gmra.mrb[10].mxu0 %vm236_vm3, %v1658_v20  ;;  %5117 = vmatprep.subr.bf16.mxu1 %v5594_v47 }
 0xfd2   :  { %5140 = vmatpush3.bf16.msra.mxu0 %v5884_v7  ;;  %4704 = vmatprep.mubr.msk.f32.mxu0 %vm5595_vm2, %v5596_v50 }
 0xfd3   :  { %5141 = vmatprep.subr.bf16.mxu0 %v5594_v47 }
 0xfd4   :  { %5119 = vmatpush3.bf16.msra.mxu1 %v5956_v4 }
 0xfd5   :  { %5120 = vmatprep.subr.bf16.mxu1 %v5594_v47 }
 0xfd6   :  { %5143 = vmatpush3.bf16.msra.mxu0 %v5894_v14 }
 0xfd7   :  { %5162 = vmatprep.subr.bf16.mxu0 %v5594_v47  ;;  %4661 = vmatmul.mubr.msk.f32.vlgmr.msra.gmra.mrb[10].mxu1 %vm236_vm3, %v962_v18  ;;  %v5124_v18 = vpack.c.bf16 %v187_v17, %v186_v60 }
 0xfd8   :  { %4671 = vmatprep.mubr.msk.f32.mxu1 %vm5595_vm2, %v5596_v50 }
 0xfd9   :  { %4705 = vmatmul.mubr.msk.f32.vlgmr.msra.gmra.mrb[10].mxu0 %vm236_vm3, %v1310_v19 }
 0xfda   :  { %5164 = vmatpush3.bf16.msra.mxu0 %v5842_v38  ;;  %4748 = vmatprep.mubr.msk.f32.mxu0 %vm5595_vm2, %v5596_v50 }
 0xfdb   :  { %5165 = vmatprep.subr.bf16.mxu0 %v5594_v47 }
 0xfde   :  { %5167 = vmatpush3.bf16.msra.mxu0 %v5855_v42 }
 0xfdf   :  { %5168 = vmatprep.subr.bf16.mxu0 %v5594_v47 }
 0xfe1   :  { %4749 = vmatmul.mubr.msk.f32.vlgmr.msra.gmra.mrb[12].mxu0 %vm236_vm3, %v1658_v20 }
 0xfe2   :  { %5170 = vmatpush3.bf16.msra.mxu0 %v5742_v48  ;;  %4759 = vmatprep.mubr.msk.f32.mxu0 %vm5595_vm2, %v5596_v50 }
 0xfe3   :  { %5171 = vmatprep.subr.bf16.mxu0 %v5594_v47 }
 0xfe6   :  { %5173 = vmatpush3.bf16.msra.mxu0 %v5753_v51 }
 0xfe7   :  { %5174 = vmatprep.subr.bf16.mxu0 %v5594_v47 }
0x10aa   :  { %v1449_v21 = vpop.f32.mrb[10].mxu1 }
0x10ab   :  { %v5310_v22 = vadd.f32 %v5811_v13, %v1449_v21  ;;  %v4662_v24 = vpop.f32.mrb[11].mxu1 }
0x10ac   :  { %v1797_v25 = vpop.f32.mrb[10].mxu0 }
0x10ad   :  { %v4706_v36 = vpop.f32.mrb[11].mxu0  ;;  %5445 = vtanh.f32 %v5310_v22  ;;  %v5311_v26 = vadd.f32 %v5773_v56, %v1797_v25  ;;  %v4184_v33 = vmul.f32 -1.442695, %v5310_v22 }
0x10af   :  { %5447 = vtanh.f32 %v5311_v26  ;;  %v4190_v23 = vmul.f32 -1.442695, %v5311_v26 }
0x10b4   :  { %v2138_v27 = vpop.f32.mrb[12].mxu0 }
0x10b5   :  { %v2142_v28 = vadd.f32 %v2138_v27, %v5722_v34  ;;  %v4750_v29 = vpop.f32.mrb[13].mxu0 }
0x10b7   :  { %5449 = vtanh.f32 %v2142_v28  ;;  %v5446_v30 = vpop.eup %5445  ;;  %v4196_v2 = vmul.f32 -1.442695, %v2142_v28 }
0x10b8   :  { %1463 = vrot.lane.b32.xlu0 %v5446_v30, %s5593_s1  ;;  %5451 = vpow2.f32 %v4184_v33 }
0x10b9   :  { %v5448_v31 = vpop.eup %5447  ;;  %5453 = vpow2.f32 %v4190_v23 }
0x10ba   :  { %5455 = vpow2.f32 %v4196_v2 }
0x10bc   :  { %1811 = vrot.lane.b32.xlu0 %v5448_v31, %s5593_s1 }
0x10c1   :  { %v5450_v32 = vpop.eup %5449 }
0x10c2   :  { %2155 = vrot.lane.b32.xlu1 %v5450_v32, %s5593_s1  ;;  %v5452_v35 = vpop.eup %5451 }
0x10c3   :  { %v1457_v37 = vadd.f32 1.0, %v5452_v35  ;;  %v5454_v39 = vpop.eup %5453 }
0x10c4   :  { %v1805_v40 = vadd.f32 1.0, %v5454_v39  ;;  %v5456_v43 = vpop.eup %5455 }
0x10c5   :  { %5457 = vrcp.f32 %v1457_v37  ;;  %v2146_v45 = vadd.f32 1.0, %v5456_v43 }
0x10c6   :  { %5459 = vrcp.f32 %v1805_v40 }
0x10c7   :  { %5461 = vrcp.f32 %v2146_v45 }
0x10cf   :  { %v5458_v46 = vpop.eup %5457 }
0x10d0   :  { %v5460_v55 = vpop.eup %5459  ;;  %v1461_v62 = vmul.f32 %v5458_v46, %v5994_v52  ;;  %v184_v52 = vld [vmem:[%s6459_s10 + $0x40] sm:$0xff] }
0x10d1   :  { %v5462_v61 = vpop.eup %5461  ;;  %v1809_v3 = vmul.f32 %v5460_v55, %v5999_v57  ;;  %v185_v57 = vld [vmem:[%s6459_s10 + $0x48] sm:$0xff] }
0x10d2   :  { %v2153_v10 = vmul.f32 %v5462_v61, %v2151_v9  ;;  %v5121_v16 = vpack.c.bf16 %v185_v57, %v184_v52 }
0x10d4   :  { %5122 = vmatpush3.bf16.msra.mxu1 %v5121_v16 }
0x10d5   :  { %5123 = vmatprep.subr.bf16.mxu1 %v5594_v47 }
0x10d8   :  { %5125 = vmatpush3.bf16.msra.mxu1 %v5124_v18 }
0x10d9   :  { %5144 = vmatprep.subr.bf16.mxu1 %v5594_v47 }
0x112a   :  { %v1464_v53 = vpop.permute.xlu0 %1463 }
0x112b   :  { %v1466_v54 = vmul.f32 %v5458_v46, %v1464_v53 }
0x112d   :  { %1468 = vrot.lane.b32.xlu1 %v1466_v54, %s5598_s28 }
0x112e   :  { %v1812_v58 = vpop.permute.xlu0 %1811 }
0x112f   :  { %v1814_v59 = vmul.f32 %v5460_v55, %v1812_v58 }
0x1131   :  { %1816 = vrot.lane.b32.xlu1 %v1814_v59, %s5598_s28 }
0x1134   :  { %v2156_v49 = vpop.permute.xlu1 %2155 }
0x1135   :  { %v2158_v44 = vmul.f32 %v5462_v61, %v2156_v49 }
0x1137   :  { %2160 = vrot.lane.b32.xlu0 %v2158_v44, %s5598_s28 }
0x119f   :  { %v1469_v0 = vpop.permute.xlu1 %1468 }
0x11a0   :  { %v6073_v1 = vadd.f32 %v1469_v0, %v1461_v62 }
0x11a2   :  { %5463 = vtanh.f32 %v6073_v1 }
0x11a3   :  { %v1817_v41 = vpop.permute.xlu1 %1816 }
0x11a4   :  { %v6077_v5 = vadd.f32 %v1817_v41, %v1809_v3 }
0x11a6   :  { %5465 = vtanh.f32 %v6077_v5 }
0x11a9   :  { %v2161_v11 = vpop.permute.xlu0 %2160 }
0x11aa   :  { %v6081_v12 = vadd.f32 %v2161_v11, %v2153_v10 }
0x11ac   :  { %5467 = vtanh.f32 %v6081_v12  ;;  %v5464_v15 = vpop.eup %5463 }
0x11ad   :  { %1474 = vrot.lane.b32.xlu0 %v5464_v15, %s5593_s1 }
0x11b0   :  { %v5466_v19 = vpop.eup %5465 }
0x11b1   :  { %1822 = vrot.lane.b32.xlu0 %v5466_v19, %s5593_s1  ;;  %v2668_v19 = vrot.slane %v6081_v12, 6  ;;  %v190_v12 = vld [vmem:[%s6459_s10 + $0x70] sm:$0xff] }
0x11b6   :  { %v5468_v20 = vpop.eup %5467 }
0x11b7   :  { %2166 = vrot.lane.b32.xlu1 %v5468_v20, %s5593_s1 }
0x121f   :  { %v1475_v21 = vpop.permute.xlu0 %1474 }
0x1220   :  { %v1477_v22 = vmul.f32 %v5458_v46, %v1475_v21 }
0x1222   :  { %1479 = vrot.lane.b32.xlu1 %v1477_v22, %s5598_s28 }
0x1223   :  { %v1823_v24 = vpop.permute.xlu0 %1822 }
0x1224   :  { %v1825_v25 = vmul.f32 %v5460_v55, %v1823_v24 }
0x1226   :  { %1827 = vrot.lane.b32.xlu1 %v1825_v25, %s5598_s28 }
0x1229   :  { %v2167_v36 = vpop.permute.xlu1 %2166 }
0x122a   :  { %v2169_v26 = vmul.f32 %v5462_v61, %v2167_v36 }
0x122c   :  { %2171 = vrot.lane.b32.xlu0 %v2169_v26, %s5598_s28  ;;  %v191_v26 = vld [vmem:[%s6459_s10 + $0x78] sm:$0xff] }
0x1294   :  { %v1480_v27 = vpop.permute.xlu1 %1479 }
0x1295   :  { %4672 = vmatmul.mubr.msk.f32.vlgmr.msra.gmra.mrb[4].mxu1 %vm236_vm3, %v1480_v27 }
0x1296   :  { %5146 = vmatpush3.bf16.msra.mxu1 %v5789_v6  ;;  %4715 = vmatprep.mubr.msk.f32.mxu1 %vm5595_vm2, %v5596_v50 }
0x1297   :  { %5147 = vmatprep.subr.bf16.mxu1 %v5594_v47 }
0x1298   :  { %v1828_v28 = vpop.permute.xlu1 %1827 }
0x129a   :  { %5149 = vmatpush3.bf16.msra.mxu1 %v5795_v8 }
0x129b   :  { %5150 = vmatprep.subr.bf16.mxu1 %v5594_v47 }
0x129d   :  { %4716 = vmatmul.mubr.msk.f32.vlgmr.msra.gmra.mrb[12].mxu1 %vm236_vm3, %v1828_v28 }
0x129e   :  { %v2172_v29 = vpop.permute.xlu0 %2171  ;;  %5152 = vmatpush3.bf16.msra.mxu1 %v5941_v63  ;;  %4726 = vmatprep.mubr.msk.f32.mxu1 %vm5595_vm2, %v5596_v50 }
0x129f   :  { %4760 = vmatmul.mubr.msk.f32.vlgmr.msra.gmra.mrb[14].mxu0 %vm236_vm3, %v2172_v29  ;;  %5153 = vmatprep.subr.bf16.mxu1 %v5594_v47 }
0x12a0   :  { %5176 = vmatpush3.bf16.msra.mxu0 %v5884_v7  ;;  %4770 = vmatprep.mubr.msk.f32.mxu0 %vm5595_vm2, %v5596_v50 }
0x12a1   :  { %5177 = vmatprep.subr.bf16.mxu0 %v5594_v47 }
0x12a2   :  { %5155 = vmatpush3.bf16.msra.mxu1 %v5956_v4 }
0x12a3   :  { %5156 = vmatprep.subr.bf16.mxu1 %v5594_v47 }
0x12a4   :  { %5179 = vmatpush3.bf16.msra.mxu0 %v5894_v14 }
0x12a5   :  { %5198 = vmatprep.subr.bf16.mxu0 %v5594_v47  ;;  %4727 = vmatmul.mubr.msk.f32.vlgmr.msra.gmra.mrb[12].mxu1 %vm236_vm3, %v1480_v27  ;;  %v5160_v27 = vpack.c.bf16 %v191_v26, %v190_v12 }
0x12a6   :  { %4737 = vmatprep.mubr.msk.f32.mxu1 %vm5595_vm2, %v5596_v50 }
0x12a7   :  { %4771 = vmatmul.mubr.msk.f32.vlgmr.msra.gmra.mrb[14].mxu0 %vm236_vm3, %v1828_v28 }
0x12a8   :  { %5200 = vmatpush3.bf16.msra.mxu0 %v5842_v38  ;;  %4814 = vmatprep.mubr.msk.f32.mxu0 %vm5595_vm2, %v5596_v50 }
0x12a9   :  { %5201 = vmatprep.subr.bf16.mxu0 %v5594_v47 }
0x12ac   :  { %5203 = vmatpush3.bf16.msra.mxu0 %v5855_v42 }
0x12ad   :  { %5204 = vmatprep.subr.bf16.mxu0 %v5594_v47 }
0x12af   :  { %4815 = vmatmul.mubr.msk.f32.vlgmr.msra.gmra.mrb[16].mxu0 %vm236_vm3, %v2172_v29 }
0x12b0   :  { %5206 = vmatpush3.bf16.msra.mxu0 %v5742_v48  ;;  %4825 = vmatprep.mubr.msk.f32.mxu0 %vm5595_vm2, %v5596_v50 }
0x12b1   :  { %5207 = vmatprep.subr.bf16.mxu0 %v5594_v47 }
0x12b4   :  { %5209 = vmatpush3.bf16.msra.mxu0 %v5753_v51 }
0x12b5   :  { %5210 = vmatprep.subr.bf16.mxu0 %v5594_v47 }
0x1378   :  { %v1967_v30 = vpop.f32.mrb[12].mxu1 }
0x1379   :  { %v5312_v31 = vadd.f32 %v5811_v13, %v1967_v30  ;;  %v4728_v32 = vpop.f32.mrb[13].mxu1 }
0x137a   :  { %v2311_v33 = vpop.f32.mrb[14].mxu0 }
0x137b   :  { %v4772_v23 = vpop.f32.mrb[15].mxu0  ;;  %5469 = vtanh.f32 %v5312_v31  ;;  %v5313_v2 = vadd.f32 %v5773_v56, %v2311_v33  ;;  %v4193_v46 = vmul.f32 -1.442695, %v5312_v31 }
0x137d   :  { %5471 = vtanh.f32 %v5313_v2  ;;  %v4199_v53 = vmul.f32 -1.442695, %v5313_v2 }
0x1382   :  { %v2652_v35 = vpop.f32.mrb[16].mxu0 }
0x1383   :  { %v2657_v37 = vrot.slane %v2652_v35, 6  ;;  %v4816_v39 = vpop.f32.mrb[17].mxu0 }
0x1385   :  { %v2659_v40 = vadd.f32 %v2657_v37, %v5722_v34  ;;  %v5470_v43 = vpop.eup %5469 }
0x1386   :  { %1981 = vrot.lane.b32.xlu0 %v5470_v43, %s5593_s1  ;;  %v6224_v43 = vld [vmem:[%s6458_s9] ss:$0 sm:$0xff] }
0x1387   :  { %5473 = vtanh.f32 %v2659_v40  ;;  %v5472_v45 = vpop.eup %5471  ;;  %v4205_v56 = vmul.f32 -1.442695, %v2659_v40 }
0x1388   :  { %5475 = vpow2.f32 %v4193_v46 }
0x1389   :  { %5477 = vpow2.f32 %v4199_v53  ;;  %v6230_v53 = vld [vmem:[%s6455_s6] ss:$0 sm:$0xff] }
0x138a   :  { %2325 = vrot.lane.b32.xlu0 %v5472_v45, %s5593_s1  ;;  %5479 = vpow2.f32 %v4205_v56 }
0x1391   :  { %v5474_v13 = vpop.eup %5473 }
0x1392   :  { %2672 = vrot.lane.b32.xlu1 %v5474_v13, %s5593_s1  ;;  %v5476_v54 = vpop.eup %5475 }
0x1393   :  { %v1975_v55 = vadd.f32 1.0, %v5476_v54  ;;  %v5478_v58 = vpop.eup %5477 }
0x1394   :  { %v2319_v59 = vadd.f32 1.0, %v5478_v58  ;;  %v5480_v61 = vpop.eup %5479 }
0x1395   :  { %5481 = vrcp.f32 %v1975_v55  ;;  %v2663_v49 = vadd.f32 1.0, %v5480_v61 }
0x1396   :  { %5483 = vrcp.f32 %v2319_v59 }
0x1397   :  { %5485 = vrcp.f32 %v2663_v49 }
0x139f   :  { %v5482_v44 = vpop.eup %5481 }
0x13a0   :  { %v5484_v3 = vpop.eup %5483  ;;  %v1979_v57 = vmul.f32 %v5482_v44, %v6073_v1  ;;  %v188_v1 = vld [vmem:[%s6459_s10 + $0x60] sm:$0xff] }
0x13a1   :  { %v5486_v10 = vpop.eup %5485  ;;  %v2323_v16 = vmul.f32 %v5484_v3, %v6077_v5  ;;  %v189_v5 = vld [vmem:[%s6459_s10 + $0x68] sm:$0xff] }
0x13a2   :  { %v2670_v20 = vmul.f32 %v5486_v10, %v2668_v19  ;;  %v5157_v36 = vpack.c.bf16 %v189_v5, %v188_v1 }
0x13a4   :  { %5158 = vmatpush3.bf16.msra.mxu1 %v5157_v36 }
0x13a5   :  { %5159 = vmatprep.subr.bf16.mxu1 %v5594_v47 }
0x13a8   :  { %5161 = vmatpush3.bf16.msra.mxu1 %v5160_v27 }
0x13a9   :  { %5180 = vmatprep.subr.bf16.mxu1 %v5594_v47 }
0x13f8   :  { %v1982_v62 = vpop.permute.xlu0 %1981 }
0x13f9   :  { %v1984_v0 = vmul.f32 %v5482_v44, %v1982_v62 }
0x13fb   :  { %1986 = vrot.lane.b32.xlu1 %v1984_v0, %s5598_s28 }
0x13fc   :  { %v2326_v41 = vpop.permute.xlu0 %2325 }
0x13fd   :  { %v2328_v9 = vmul.f32 %v5484_v3, %v2326_v41 }
0x13ff   :  { %2330 = vrot.lane.b32.xlu1 %v2328_v9, %s5598_s28 }
0x1404   :  { %v2673_v11 = vpop.permute.xlu1 %2672 }
0x1405   :  { %v2675_v52 = vmul.f32 %v5486_v10, %v2673_v11 }
0x1407   :  { %2677 = vrot.lane.b32.xlu0 %v2675_v52, %s5598_s28 }
0x146d   :  { %v1987_v60 = vpop.permute.xlu1 %1986 }
0x146e   :  { %v6152_v15 = vadd.f32 %v1987_v60, %v1979_v57 }
0x1470   :  { %5487 = vtanh.f32 %v6152_v15 }
0x1471   :  { %v2331_v17 = vpop.permute.xlu1 %2330 }
0x1472   :  { %v6156_v18 = vadd.f32 %v2331_v17, %v2323_v16 }
0x1474   :  { %5489 = vtanh.f32 %v6156_v18 }
0x1479   :  { %v2678_v21 = vpop.permute.xlu0 %2677 }
0x147a   :  { %v6160_v22 = vadd.f32 %v2678_v21, %v2670_v20  ;;  %v5488_v24 = vpop.eup %5487 }
0x147b   :  { %1992 = vrot.lane.b32.xlu0 %v5488_v24, %s5593_s1 }
0x147c   :  { %5491 = vtanh.f32 %v6160_v22 }
0x147e   :  { %v5490_v25 = vpop.eup %5489 }
0x147f   :  { %2336 = vrot.lane.b32.xlu0 %v5490_v25, %s5593_s1 }
0x1486   :  { %v5492_v28 = vpop.eup %5491 }
0x1487   :  { %2683 = vrot.lane.b32.xlu1 %v5492_v28, %s5593_s1 }
0x14ed   :  { %v1993_v29 = vpop.permute.xlu0 %1992 }
0x14ee   :  { %v1995_v30 = vmul.f32 %v5482_v44, %v1993_v29 }
0x14f0   :  { %1997 = vrot.lane.b32.xlu1 %v1995_v30, %s5598_s28 }
0x14f1   :  { %v2337_v31 = vpop.permute.xlu0 %2336 }
0x14f2   :  { %v2339_v32 = vmul.f32 %v5484_v3, %v2337_v31  ;;  %v3186_v31 = vrot.slane %v6160_v22, 6  ;;  %v194_v22 = vld [vmem:[%s6459_s10 + $0x90] sm:$0xff] }
0x14f4   :  { %2341 = vrot.lane.b32.xlu1 %v2339_v32, %s5598_s28 }
0x14f9   :  { %v2684_v33 = vpop.permute.xlu1 %2683 }
0x14fa   :  { %v2686_v23 = vmul.f32 %v5486_v10, %v2684_v33 }
0x14fc   :  { %v2688_v2 = vrot.slane %v2686_v23, 2 }
0x14fe   :  { %2689 = vrot.lane.b32.xlu0 %v2688_v2, %s5598_s28  ;;  %v193_v2 = vld [vmem:[%s6459_s10 + $0x88] sm:$0xff] }
0x1562   :  { %v1998_v35 = vpop.permute.xlu1 %1997 }
0x1563   :  { %4738 = vmatmul.mubr.msk.f32.vlgmr.msra.gmra.mrb[4].mxu1 %vm236_vm3, %v1998_v35 }
0x1564   :  { %5182 = vmatpush3.bf16.msra.mxu1 %v5789_v6  ;;  %4781 = vmatprep.mubr.msk.f32.mxu1 %vm5595_vm2, %v5596_v50 }
0x1565   :  { %5183 = vmatprep.subr.bf16.mxu1 %v5594_v47 }
0x1566   :  { %v2342_v37 = vpop.permute.xlu1 %2341 }
0x1568   :  { %5185 = vmatpush3.bf16.msra.mxu1 %v5795_v8 }
0x1569   :  { %5186 = vmatprep.subr.bf16.mxu1 %v5594_v47 }
0x156b   :  { %4782 = vmatmul.mubr.msk.f32.vlgmr.msra.gmra.mrb[14].mxu1 %vm236_vm3, %v2342_v37 }
0x156c   :  { %5188 = vmatpush3.bf16.msra.mxu1 %v5941_v63  ;;  %4792 = vmatprep.mubr.msk.f32.mxu1 %vm5595_vm2, %v5596_v50 }
0x156d   :  { %5189 = vmatprep.subr.bf16.mxu1 %v5594_v47 }
0x1570   :  { %v2690_v39 = vpop.permute.xlu0 %2689  ;;  %5191 = vmatpush3.bf16.msra.mxu1 %v5956_v4 }
0x1571   :  { %4826 = vmatmul.mubr.msk.f32.vlgmr.msra.gmra.mrb[18].mxu0 %vm236_vm3, %v2690_v39  ;;  %5192 = vmatprep.subr.bf16.mxu1 %v5594_v47 }
0x1572   :  { %5212 = vmatpush3.bf16.msra.mxu0 %v5884_v7  ;;  %4836 = vmatprep.mubr.msk.f32.mxu0 %vm5595_vm2, %v5596_v50 }
0x1573   :  { %5213 = vmatprep.subr.bf16.mxu0 %v5594_v47  ;;  %4793 = vmatmul.mubr.msk.f32.vlgmr.msra.gmra.mrb[14].mxu1 %vm236_vm3, %v1998_v35 }
0x1574   :  { %4803 = vmatprep.mubr.msk.f32.mxu1 %vm5595_vm2, %v5596_v50 }
0x1576   :  { %5215 = vmatpush3.bf16.msra.mxu0 %v5894_v14 }
0x1577   :  { %5234 = vmatprep.subr.bf16.mxu0 %v5594_v47 }
0x1579   :  { %4837 = vmatmul.mubr.msk.f32.vlgmr.msra.gmra.mrb[18].mxu0 %vm236_vm3, %v2342_v37  ;;  %v195_v37 = vld [vmem:[%s6459_s10 + $0x98] sm:$0xff] }
0x157a   :  { %5236 = vmatpush3.bf16.msra.mxu0 %v5842_v38  ;;  %4880 = vmatprep.mubr.msk.f32.mxu0 %vm5595_vm2, %v5596_v50 }
0x157b   :  { %5237 = vmatprep.subr.bf16.mxu0 %v5594_v47 }
0x157e   :  { %5239 = vmatpush3.bf16.msra.mxu0 %v5855_v42 }
0x157f   :  { %5240 = vmatprep.subr.bf16.mxu0 %v5594_v47 }
0x1581   :  { %4881 = vmatmul.mubr.msk.f32.vlgmr.msra.gmra.mrb[20].mxu0 %vm236_vm3, %v2690_v39  ;;  %v5196_v39 = vpack.c.bf16 %v195_v37, %v194_v22 }
0x1582   :  { %5242 = vmatpush3.bf16.msra.mxu0 %v5742_v48  ;;  %4891 = vmatprep.mubr.msk.f32.mxu0 %vm5595_vm2, %v5596_v50 }
0x1583   :  { %5243 = vmatprep.subr.bf16.mxu0 %v5594_v47 }
0x1586   :  { %5245 = vmatpush3.bf16.msra.mxu0 %v5753_v51 }
0x1587   :  { %5246 = vmatprep.subr.bf16.mxu0 %v5594_v47 }
0x1646   :  { %v2481_v40 = vpop.f32.mrb[14].mxu1 }
0x1647   :  { %v5314_v45 = vadd.f32 %v6224_v43, %v2481_v40  ;;  %v4794_v13 = vpop.f32.mrb[15].mxu1 }
0x1649   :  { %5493 = vtanh.f32 %v5314_v45  ;;  %v4202_v0 = vmul.f32 -1.442695, %v5314_v45 }
0x164c   :  { %v2829_v46 = vpop.f32.mrb[18].mxu0 }
0x164d   :  { %v5315_v56 = vadd.f32 %v6230_v53, %v2829_v46  ;;  %v4838_v54 = vpop.f32.mrb[19].mxu0 }
0x164f   :  { %5495 = vtanh.f32 %v5315_v56  ;;  %v4208_v3 = vmul.f32 -1.442695, %v5315_v56 }
0x1653   :  { %v5494_v55 = vpop.eup %5493 }
0x1654   :  { %v3170_v58 = vpop.f32.mrb[20].mxu0  ;;  %2495 = vrot.lane.b32.xlu0 %v5494_v55, %s5593_s1 }
0x1655   :  { %v3175_v59 = vrot.slane %v3170_v58, 4  ;;  %v4882_v61 = vpop.f32.mrb[21].mxu0 }
0x1657   :  { %v3177_v49 = vadd.f32 %v3175_v59, %v5722_v34 }
0x1659   :  { %v5496_v44 = vpop.eup %5495  ;;  %5497 = vtanh.f32 %v3177_v49  ;;  %v4214_v9 = vmul.f32 -1.442695, %v3177_v49 }
0x165a   :  { %2843 = vrot.lane.b32.xlu1 %v5496_v44, %s5593_s1  ;;  %5499 = vpow2.f32 %v4202_v0 }
0x165b   :  { %5501 = vpow2.f32 %v4208_v3 }
0x165c   :  { %5503 = vpow2.f32 %v4214_v9 }
0x1663   :  { %v5498_v62 = vpop.eup %5497 }
0x1664   :  { %3190 = vrot.lane.b32.xlu0 %v5498_v62, %s5593_s1  ;;  %v5500_v41 = vpop.eup %5499 }
0x1665   :  { %v2489_v10 = vadd.f32 1.0, %v5500_v41  ;;  %v5502_v11 = vpop.eup %5501 }
0x1666   :  { %v2837_v52 = vadd.f32 1.0, %v5502_v11  ;;  %v5504_v57 = vpop.eup %5503 }
0x1667   :  { %5505 = vrcp.f32 %v2489_v10  ;;  %v3181_v19 = vadd.f32 1.0, %v5504_v57 }
0x1668   :  { %5507 = vrcp.f32 %v2837_v52 }
0x1669   :  { %5509 = vrcp.f32 %v3181_v19 }
0x1671   :  { %v5506_v60 = vpop.eup %5505 }
0x1672   :  { %v5508_v20 = vpop.eup %5507  ;;  %v2493_v25 = vmul.f32 %v5506_v60, %v6152_v15 }
0x1673   :  { %v5510_v1 = vpop.eup %5509  ;;  %v2841_v27 = vmul.f32 %v5508_v20, %v6156_v18  ;;  %v192_v18 = vld [vmem:[%s6459_s10 + $0x80] sm:$0xff] }
0x1674   :  { %v3188_v32 = vmul.f32 %v5510_v1, %v3186_v31  ;;  %v5193_v35 = vpack.c.bf16 %v193_v2, %v192_v18 }
0x1676   :  { %5194 = vmatpush3.bf16.msra.mxu1 %v5193_v35 }
0x1677   :  { %5195 = vmatprep.subr.bf16.mxu1 %v5594_v47 }
0x167a   :  { %5197 = vmatpush3.bf16.msra.mxu1 %v5196_v39 }
0x167b   :  { %5216 = vmatprep.subr.bf16.mxu1 %v5594_v47 }
0x16c6   :  { %v2496_v16 = vpop.permute.xlu0 %2495 }
0x16c7   :  { %v2498_v17 = vmul.f32 %v5506_v60, %v2496_v16 }
0x16c9   :  { %2500 = vrot.lane.b32.xlu1 %v2498_v17, %s5598_s28 }
0x16cc   :  { %v2844_v21 = vpop.permute.xlu1 %2843 }
0x16cd   :  { %v2846_v24 = vmul.f32 %v5508_v20, %v2844_v21 }
0x16cf   :  { %2848 = vrot.lane.b32.xlu0 %v2846_v24, %s5598_s28 }
0x16d6   :  { %v3191_v5 = vpop.permute.xlu0 %3190 }
0x16d7   :  { %v3193_v12 = vmul.f32 %v5510_v1, %v3191_v5 }
0x16d9   :  { %3195 = vrot.lane.b32.xlu1 %v3193_v12, %s5598_s28 }
0x173b   :  { %v2501_v36 = vpop.permute.xlu1 %2500 }
0x173c   :  { %v6241_v26 = vadd.f32 %v2501_v36, %v2493_v25 }
0x173e   :  { %5511 = vtanh.f32 %v6241_v26 }
0x1741   :  { %v2849_v28 = vpop.permute.xlu0 %2848 }
0x1742   :  { %v6245_v29 = vadd.f32 %v2849_v28, %v2841_v27 }
0x1744   :  { %5513 = vtanh.f32 %v6245_v29 }
0x1748   :  { %v5512_v30 = vpop.eup %5511 }
0x1749   :  { %2506 = vrot.lane.b32.xlu0 %v5512_v30, %s5593_s1 }
0x174b   :  { %v3196_v33 = vpop.permute.xlu1 %3195 }
0x174c   :  { %v6250_v15 = vadd.f32 %v3196_v33, %v3188_v32 }
0x174e   :  { %v5514_v23 = vpop.eup %5513  ;;  %5515 = vtanh.f32 %v6250_v15  ;;  %v3704_v37 = vrot.slane %v6250_v15, 6 }
0x174f   :  { %2854 = vrot.lane.b32.xlu1 %v5514_v23, %s5593_s1 }
0x1758   :  { %v5516_v40 = vpop.eup %5515 }
0x1759   :  { %3201 = vrot.lane.b32.xlu0 %v5516_v40, %s5593_s1 }
0x17bb   :  { %v2507_v45 = vpop.permute.xlu0 %2506 }
0x17bc   :  { %v2509_v13 = vmul.f32 %v5506_v60, %v2507_v45 }
0x17be   :  { %2511 = vrot.lane.b32.xlu1 %v2509_v13, %s5598_s28  ;;  %v197_v13 = vld [vmem:[%s6459_s10 + $0xa8] sm:$0xff] }
0x17c1   :  { %v2855_v46 = vpop.permute.xlu1 %2854 }
0x17c2   :  { %v2857_v56 = vmul.f32 %v5508_v20, %v2855_v46  ;;  %v198_v46 = vld [vmem:[%s6459_s10 + $0xb0] sm:$0xff] }
0x17c4   :  { %2859 = vrot.lane.b32.xlu0 %v2857_v56, %s5598_s28  ;;  %v199_v56 = vld [vmem:[%s6459_s10 + $0xb8] sm:$0xff] }
0x17cb   :  { %v3202_v54 = vpop.permute.xlu0 %3201 }
0x17cc   :  { %v3204_v55 = vmul.f32 %v5510_v1, %v3202_v54  ;;  %v5232_v54 = vpack.c.bf16 %v199_v56, %v198_v46 }
0x17ce   :  { %v3206_v58 = vrot.slane %v3204_v55, 4 }
0x17d0   :  { %3207 = vrot.lane.b32.xlu1 %v3206_v58, %s5598_s28 }
0x1830   :  { %v2512_v59 = vpop.permute.xlu1 %2511 }
0x1831   :  { %4804 = vmatmul.mubr.msk.f32.vlgmr.msra.gmra.mrb[4].mxu1 %vm236_vm3, %v2512_v59 }
0x1832   :  { %5218 = vmatpush3.bf16.msra.mxu1 %v5789_v6  ;;  %4847 = vmatprep.mubr.msk.f32.mxu1 %vm5595_vm2, %v5596_v50 }
0x1833   :  { %5219 = vmatprep.subr.bf16.mxu1 %v5594_v47 }
0x1836   :  { %5221 = vmatpush3.bf16.msra.mxu1 %v5795_v8  ;;  %v2860_v61 = vpop.permute.xlu0 %2859 }
0x1837   :  { %5222 = vmatprep.subr.bf16.mxu1 %v5594_v47 }
0x1839   :  { %4848 = vmatmul.mubr.msk.f32.vlgmr.msra.gmra.mrb[16].mxu1 %vm236_vm3, %v2860_v61 }
0x183a   :  { %5224 = vmatpush3.bf16.msra.mxu1 %v5941_v63  ;;  %4858 = vmatprep.mubr.msk.f32.mxu1 %vm5595_vm2, %v5596_v50 }
0x183b   :  { %5225 = vmatprep.subr.bf16.mxu1 %v5594_v47 }
0x183e   :  { %5227 = vmatpush3.bf16.msra.mxu1 %v5956_v4 }
0x183f   :  { %5228 = vmatprep.subr.bf16.mxu1 %v5594_v47 }
0x1841   :  { %4859 = vmatmul.mubr.msk.f32.vlgmr.msra.gmra.mrb[16].mxu1 %vm236_vm3, %v2512_v59 }
0x1842   :  { %v3208_v49 = vpop.permute.xlu1 %3207  ;;  %4869 = vmatprep.mubr.msk.f32.mxu1 %vm5595_vm2, %v5596_v50 }
0x1843   :  { %4892 = vmatmul.mubr.msk.f32.vlgmr.msra.gmra.mrb[22].mxu0 %vm236_vm3, %v3208_v49 }
0x1844   :  { %5248 = vmatpush3.bf16.msra.mxu0 %v5884_v7  ;;  %4902 = vmatprep.mubr.msk.f32.mxu0 %vm5595_vm2, %v5596_v50 }
0x1845   :  { %5249 = vmatprep.subr.bf16.mxu0 %v5594_v47 }
0x1848   :  { %5251 = vmatpush3.bf16.msra.mxu0 %v5894_v14 }
0x1849   :  { %5270 = vmatprep.subr.bf16.mxu0 %v5594_v47 }
0x184b   :  { %4903 = vmatmul.mubr.msk.f32.vlgmr.msra.gmra.mrb[22].mxu0 %vm236_vm3, %v2860_v61 }
0x184c   :  { %5272 = vmatpush3.bf16.msra.mxu0 %v5842_v38  ;;  %4946 = vmatprep.mubr.msk.f32.mxu0 %vm5595_vm2, %v5596_v50 }
0x184d   :  { %5273 = vmatprep.subr.bf16.mxu0 %v5594_v47 }
0x1850   :  { %5275 = vmatpush3.bf16.msra.mxu0 %v5855_v42 }
0x1851   :  { %5276 = vmatprep.subr.bf16.mxu0 %v5594_v47 }
0x1853   :  { %4947 = vmatmul.mubr.msk.f32.vlgmr.msra.gmra.mrb[24].mxu0 %vm236_vm3, %v3208_v49 }
0x1854   :  { %5278 = vmatpush3.bf16.msra.mxu0 %v5742_v48  ;;  %4957 = vmatprep.mubr.msk.f32.mxu0 %vm5595_vm2, %v5596_v50 }
0x1855   :  { %5279 = vmatprep.subr.bf16.mxu0 %v5594_v47 }
0x1858   :  { %5281 = vmatpush3.bf16.msra.mxu0 %v5753_v51 }
0x1859   :  { %5282 = vmatprep.subr.bf16.mxu0 %v5594_v47 }
0x1914   :  { %v2999_v38 = vpop.f32.mrb[16].mxu1 }
0x1915   :  { %v5316_v44 = vadd.f32 %v6224_v43, %v2999_v38  ;;  %v4860_v62 = vpop.f32.mrb[17].mxu1 }
0x1917   :  { %5517 = vtanh.f32 %v5316_v44  ;;  %v4211_v57 = vmul.f32 -1.442695, %v5316_v44 }
0x191e   :  { %v3347_v42 = vpop.f32.mrb[22].mxu0 }
0x191f   :  { %v5317_v0 = vadd.f32 %v6230_v53, %v3347_v42  ;;  %v4904_v3 = vpop.f32.mrb[23].mxu0 }
0x1921   :  { %v5518_v41 = vpop.eup %5517  ;;  %5519 = vtanh.f32 %v5317_v0  ;;  %v4217_v60 = vmul.f32 -1.442695, %v5317_v0 }
0x1922   :  { %3013 = vrot.lane.b32.xlu0 %v5518_v41, %s5593_s1 }
0x1926   :  { %v3688_v48 = vpop.f32.mrb[24].mxu0 }
0x1927   :  { %v3693_v9 = vrot.slane %v3688_v48, 2  ;;  %v4948_v10 = vpop.f32.mrb[25].mxu0 }
0x1929   :  { %v3695_v51 = vadd.f32 %v3693_v9, %v5722_v34 }
0x192b   :  { %v5520_v11 = vpop.eup %5519  ;;  %5521 = vtanh.f32 %v3695_v51  ;;  %v4223_v19 = vmul.f32 -1.442695, %v3695_v51 }
0x192c   :  { %3361 = vrot.lane.b32.xlu1 %v5520_v11, %s5593_s1  ;;  %5523 = vpow2.f32 %v4211_v57 }
0x192d   :  { %5525 = vpow2.f32 %v4217_v60 }
0x1935   :  { %v5522_v52 = vpop.eup %5521 }
0x1936   :  { %3708 = vrot.lane.b32.xlu0 %v5522_v52, %s5593_s1  ;;  %v5524_v16 = vpop.eup %5523 }
0x1937   :  { %v3007_v17 = vadd.f32 1.0, %v5524_v16  ;;  %v5526_v20 = vpop.eup %5525 }
0x1938   :  { %v3355_v21 = vadd.f32 1.0, %v5526_v20 }
0x1939   :  { %5527 = vrcp.f32 %v3007_v17 }
0x193a   :  { %5529 = vpow2.f32 %v4223_v19 }
0x193b   :  { %5531 = vrcp.f32 %v3355_v21 }
0x1943   :  { %v5528_v24 = vpop.eup %5527 }
0x1944   :  { %v5530_v5 = vpop.eup %5529  ;;  %v3011_v32 = vmul.f32 %v5528_v24, %v6241_v26 }
0x1945   :  { %v3699_v12 = vadd.f32 1.0, %v5530_v5  ;;  %v5532_v25 = vpop.eup %5531 }
0x1946   :  { %v3359_v18 = vmul.f32 %v5532_v25, %v6245_v29  ;;  %v196_v29 = vld [vmem:[%s6459_s10 + $0xa0] sm:$0xff] }
0x1947   :  { %5533 = vrcp.f32 %v3699_v12  ;;  %v5229_v15 = vpack.c.bf16 %v197_v13, %v196_v29 }
0x1949   :  { %5230 = vmatpush3.bf16.msra.mxu1 %v5229_v15 }
0x194a   :  { %5231 = vmatprep.subr.bf16.mxu1 %v5594_v47 }
0x194d   :  { %5233 = vmatpush3.bf16.msra.mxu1 %v5232_v54 }
0x194e   :  { %5252 = vmatprep.subr.bf16.mxu1 %v5594_v47 }
0x1951   :  { %v5534_v28 = vpop.eup %5533 }
0x1952   :  { %v3706_v39 = vmul.f32 %v5534_v28, %v3704_v37 }
0x1994   :  { %v3014_v34 = vpop.permute.xlu0 %3013 }
0x1995   :  { %v3016_v1 = vmul.f32 %v5528_v24, %v3014_v34 }
0x1997   :  { %3018 = vrot.lane.b32.xlu1 %v3016_v1, %s5598_s28 }
0x199e   :  { %v3362_v36 = vpop.permute.xlu1 %3361 }
0x199f   :  { %v3364_v27 = vmul.f32 %v5532_v25, %v3362_v36 }
0x19a1   :  { %3366 = vrot.lane.b32.xlu0 %v3364_v27, %s5598_s28 }
0x19a8   :  { %v3709_v30 = vpop.permute.xlu0 %3708 }
0x19a9   :  { %v3711_v31 = vmul.f32 %v5534_v28, %v3709_v30 }
0x19ab   :  { %3713 = vrot.lane.b32.xlu1 %v3711_v31, %s5598_s28  ;;  %v200_v31 = vld [vmem:[%s6459_s10 + $0xc0] sm:$0xff] }
0x1a09   :  { %v3019_v33 = vpop.permute.xlu1 %3018 }
0x1a0a   :  { %v6320_v23 = vadd.f32 %v3019_v33, %v3011_v32  ;;  %v201_v32 = vld [vmem:[%s6459_s10 + $0xc8] sm:$0xff]  ;;  %v202_v33 = vld [vmem:[%s6459_s10 + $0xd0] sm:$0xff] }
0x1a0c   :  { %5535 = vtanh.f32 %v6320_v23 }
0x1a13   :  { %v3367_v2 = vpop.permute.xlu0 %3366 }
0x1a14   :  { %v6324_v22 = vadd.f32 %v3367_v2, %v3359_v18  ;;  %v203_v18 = vld [vmem:[%s6459_s10 + $0xd8] sm:$0xff] }
0x1a15   :  { %v5268_v2 = vpack.c.bf16 %v203_v18, %v202_v33 }
0x1a16   :  { %v5536_v35 = vpop.eup %5535  ;;  %5537 = vtanh.f32 %v6324_v22 }
0x1a17   :  { %3024 = vrot.lane.b32.xlu0 %v5536_v35, %s5593_s1 }
0x1a1d   :  { %v3714_v40 = vpop.permute.xlu1 %3713 }
0x1a1e   :  { %v3716_v26 = vadd.f32 %v3714_v40, %v3706_v39 }
0x1a20   :  { %v5538_v45 = vpop.eup %5537  ;;  %5539 = vtanh.f32 %v3716_v26 }
0x1a21   :  { %3372 = vrot.lane.b32.xlu1 %v5538_v45, %s5593_s1 }
0x1a2a   :  { %v5540_v55 = vpop.eup %5539 }
0x1a2b   :  { %3719 = vrot.lane.b32.xlu0 %v5540_v55, %s5593_s1 }
0x1a89   :  { %v3025_v58 = vpop.permute.xlu0 %3024 }
0x1a8a   :  { %v3027_v59 = vmul.f32 %v5528_v24, %v3025_v58 }
0x1a8c   :  { %3029 = vrot.lane.b32.xlu1 %v3027_v59, %s5598_s28  ;;  %v205_v59 = vld [vmem:[%s6459_s10 + $0xe8] sm:$0xff] }
0x1a93   :  { %v3373_v61 = vpop.permute.xlu1 %3372 }
0x1a94   :  { %v3375_v49 = vmul.f32 %v5532_v25, %v3373_v61  ;;  %v206_v61 = vld [vmem:[%s6459_s10 + $0xf0] sm:$0xff] }
0x1a96   :  { %3377 = vrot.lane.b32.xlu0 %v3375_v49, %s5598_s28 }
0x1a9d   :  { %v3720_v38 = vpop.permute.xlu0 %3719 }
0x1a9e   :  { %v3722_v44 = vmul.f32 %v5534_v28, %v3720_v38  ;;  %v207_v38 = vld [vmem:[%s6459_s10 + $0xf8] sm:$0xff] }
0x1aa0   :  { %v3724_v62 = vrot.slane %v3722_v44, 6  ;;  %v5304_v44 = vpack.c.bf16 %v207_v38, %v206_v61 }
0x1aa2   :  { %3725 = vrot.lane.b32.xlu1 %v3724_v62, %s5598_s28 }
0x1afe   :  { %v3030_v42 = vpop.permute.xlu1 %3029 }
0x1aff   :  { %4870 = vmatmul.mubr.msk.f32.vlgmr.msra.gmra.mrb[4].mxu1 %vm236_vm3, %v3030_v42 }
0x1b00   :  { %5254 = vmatpush3.bf16.msra.mxu1 %v5789_v6  ;;  %4913 = vmatprep.mubr.msk.f32.mxu1 %vm5595_vm2, %v5596_v50 }
0x1b01   :  { %5255 = vmatprep.subr.bf16.mxu1 %v5594_v47 }
0x1b04   :  { %5257 = vmatpush3.bf16.msra.mxu1 %v5795_v8 }
0x1b05   :  { %5258 = vmatprep.subr.bf16.mxu1 %v5594_v47 }
0x1b08   :  { %v3378_v0 = vpop.permute.xlu0 %3377 }
0x1b09   :  { %4914 = vmatmul.mubr.msk.f32.vlgmr.msra.gmra.mrb[18].mxu1 %vm236_vm3, %v3378_v0 }
0x1b0a   :  { %5260 = vmatpush3.bf16.msra.mxu1 %v5941_v63  ;;  %4924 = vmatprep.mubr.msk.f32.mxu1 %vm5595_vm2, %v5596_v50 }
0x1b0b   :  { %5261 = vmatprep.subr.bf16.mxu1 %v5594_v47 }
0x1b0e   :  { %5263 = vmatpush3.bf16.msra.mxu1 %v5956_v4 }
0x1b0f   :  { %5264 = vmatprep.subr.bf16.mxu1 %v5594_v47 }
0x1b11   :  { %4925 = vmatmul.mubr.msk.f32.vlgmr.msra.gmra.mrb[18].mxu1 %vm236_vm3, %v3030_v42 }
0x1b12   :  { %4935 = vmatprep.mubr.msk.f32.mxu1 %vm5595_vm2, %v5596_v50 }
0x1b14   :  { %v3726_v3 = vpop.permute.xlu1 %3725 }
0x1b15   :  { %4958 = vmatmul.mubr.msk.f32.vlgmr.msra.gmra.mrb[26].mxu0 %vm236_vm3, %v3726_v3 }
0x1b16   :  { %5284 = vmatpush3.bf16.msra.mxu0 %v5884_v7  ;;  %4968 = vmatprep.mubr.msk.f32.mxu0 %vm5595_vm2, %v5596_v50 }
0x1b17   :  { %5285 = vmatprep.subr.bf16.mxu0 %v5594_v47 }
0x1b1a   :  { %5287 = vmatpush3.bf16.msra.mxu0 %v5894_v14 }
0x1b1d   :  { %4969 = vmatmul.mubr.msk.f32.vlgmr.msra.gmra.mrb[26].mxu0 %vm236_vm3, %v3378_v0 }
0x1be4   :  { %v3517_v41 = vpop.f32.mrb[18].mxu1 }
0x1be5   :  { %v5318_v48 = vadd.f32 %v6224_v43, %v3517_v41  ;;  %v4926_v9 = vpop.f32.mrb[19].mxu1  ;;  %v4167_v41 = vld [vmem:[%s6460_s11] ss:$0 sm:$0xff] }
0x1be7   :  { %5541 = vtanh.f32 %v5318_v48  ;;  %v4220_v57 = vmul.f32 -1.442695, %v5318_v48 }
0x1bf0   :  { %v3865_v10 = vpop.f32.mrb[26].mxu0 }
0x1bf1   :  { %v5542_v51 = vpop.eup %5541  ;;  %v5319_v11 = vadd.f32 %v6230_v53, %v3865_v10  ;;  %v4970_v52 = vpop.f32.mrb[27].mxu0 }
0x1bf2   :  { %3531 = vrot.lane.b32.xlu0 %v5542_v51, %s5593_s1 }
0x1bf3   :  { %5543 = vtanh.f32 %v5319_v11  ;;  %v4226_v14 = vmul.f32 -1.442695, %v5319_v11 }
0x1bf4   :  { %5545 = vpow2.f32 %v4220_v57 }
0x1bf5   :  { %5547 = vpow2.f32 %v4226_v14 }
0x1bfd   :  { %v5544_v7 = vpop.eup %5543 }
0x1bfe   :  { %3879 = vrot.lane.b32.xlu1 %v5544_v7, %s5593_s1  ;;  %v5546_v60 = vpop.eup %5545 }
0x1bff   :  { %v3525_v16 = vadd.f32 1.0, %v5546_v60  ;;  %v5548_v17 = vpop.eup %5547 }
0x1c00   :  { %v3873_v19 = vadd.f32 1.0, %v5548_v17 }
0x1c01   :  { %5549 = vrcp.f32 %v3525_v16 }
0x1c02   :  { %5551 = vrcp.f32 %v3873_v19 }
0x1c0b   :  { %v5550_v20 = vpop.eup %5549 }
0x1c0c   :  { %v5552_v53 = vpop.eup %5551  ;;  %v3529_v5 = vmul.f32 %v5550_v20, %v6320_v23  ;;  %v5265_v23 = vpack.c.bf16 %v201_v32, %v200_v31 }
0x1c0d   :  { %v3877_v36 = vmul.f32 %v5552_v53, %v6324_v22 }
0x1c0e   :  { %5266 = vmatpush3.bf16.msra.mxu1 %v5265_v23 }
0x1c0f   :  { %5267 = vmatprep.subr.bf16.mxu1 %v5594_v47 }
0x1c12   :  { %5269 = vmatpush3.bf16.msra.mxu1 %v5268_v2 }
0x1c13   :  { %5288 = vmatprep.subr.bf16.mxu1 %v5594_v47 }
0x1c64   :  { %v3532_v21 = vpop.permute.xlu0 %3531 }
0x1c65   :  { %v3534_v24 = vmul.f32 %v5550_v20, %v3532_v21 }
0x1c67   :  { %3536 = vrot.lane.b32.xlu0 %v3534_v24, %s5598_s28 }
0x1c70   :  { %v3880_v34 = vpop.permute.xlu1 %3879 }
0x1c71   :  { %v3882_v1 = vmul.f32 %v5552_v53, %v3880_v34 }
0x1c73   :  { %3884 = vrot.lane.b32.xlu1 %v3882_v1, %s5598_s28 }
0x1cd9   :  { %v3537_v12 = vpop.permute.xlu0 %3536 }
0x1cda   :  { %v3539_v25 = vadd.f32 %v3537_v12, %v3529_v5 }
0x1cdc   :  { %5553 = vtanh.f32 %v3539_v25 }
0x1ce5   :  { %v3885_v27 = vpop.permute.xlu1 %3884 }
0x1ce6   :  { %v5554_v28 = vpop.eup %5553  ;;  %v3887_v30 = vadd.f32 %v3885_v27, %v3877_v36 }
0x1ce7   :  { %3542 = vrot.lane.b32.xlu0 %v5554_v28, %s5593_s1 }
0x1ce8   :  { %5555 = vtanh.f32 %v3887_v30 }
0x1cf2   :  { %v5556_v22 = vpop.eup %5555 }
0x1cf3   :  { %3890 = vrot.lane.b32.xlu1 %v5556_v22, %s5593_s1 }
0x1d59   :  { %v3543_v35 = vpop.permute.xlu0 %3542 }
0x1d5a   :  { %v3545_v37 = vmul.f32 %v5550_v20, %v3543_v35 }
0x1d5c   :  { %3547 = vrot.lane.b32.xlu0 %v3545_v37, %s5598_s28 }
0x1d65   :  { %v3891_v39 = vpop.permute.xlu1 %3890 }
0x1d66   :  { %v3893_v40 = vmul.f32 %v5552_v53, %v3891_v39 }
0x1d68   :  { %3895 = vrot.lane.b32.xlu1 %v3893_v40, %s5598_s28 }
0x1dce   :  { %v3548_v26 = vpop.permute.xlu0 %3547 }
0x1dcf   :  { %4936 = vmatmul.mubr.msk.f32.vlgmr.msra.gmra.mrb[4].mxu1 %vm236_vm3, %v3548_v26 }
0x1dd0   :  { %5290 = vmatpush3.bf16.msra.mxu1 %v5789_v6  ;;  %4979 = vmatprep.mubr.msk.f32.mxu1 %vm5595_vm2, %v5596_v50 }
0x1dd1   :  { %5291 = vmatprep.subr.bf16.mxu1 %v5594_v47 }
0x1dd4   :  { %5293 = vmatpush3.bf16.msra.mxu1 %v5795_v8 }
0x1dd5   :  { %5294 = vmatprep.subr.bf16.mxu1 %v5594_v47 }
0x1dda   :  { %v3896_v45 = vpop.permute.xlu1 %3895 }
0x1ddb   :  { %4980 = vmatmul.mubr.msk.f32.vlgmr.msra.gmra.mrb[20].mxu1 %vm236_vm3, %v3896_v45 }
0x1ddc   :  { %5296 = vmatpush3.bf16.msra.mxu1 %v5941_v63  ;;  %4990 = vmatprep.mubr.msk.f32.mxu1 %vm5595_vm2, %v5596_v50 }
0x1ddd   :  { %5297 = vmatprep.subr.bf16.mxu1 %v5594_v47 }
0x1de0   :  { %5299 = vmatpush3.bf16.msra.mxu1 %v5956_v4 }
0x1de1   :  { %5300 = vmatprep.subr.bf16.mxu1 %v5594_v47 }
0x1de3   :  { %4991 = vmatmul.mubr.msk.f32.vlgmr.msra.gmra.mrb[20].mxu1 %vm236_vm3, %v3548_v26 }
0x1de4   :  { %5001 = vmatprep.mubr.msk.f32.mxu1 %vm5595_vm2, %v5596_v50 }
0x1eb6   :  { %v4035_v6 = vpop.f32.mrb[20].mxu1 }
0x1eb7   :  { %v5320_v8 = vadd.f32 %v6224_v43, %v4035_v6  ;;  %v4992_v29 = vpop.f32.mrb[21].mxu1  ;;  %v204_v43 = vld [vmem:[%s6459_s10 + $0xe0] sm:$0xff]  ;;  %s5599_s10 = smov [#allocation2]  }
0x1eb8   :  { %v5301_v49 = vpack.c.bf16 %v205_v59, %v204_v43  ;;  %s4148_s19 = sshll.u32 %s5599_s10, 4  ;;  %s4149_s19 = int_to_ptr.vmem [resolvable:$true] %s4148_s19 }
0x1eb9   :  { %5557 = vtanh.f32 %v5320_v8  ;;  %v4229_v13 = vmul.f32 -1.442695, %v5320_v8  ;;  %p5572_p1 = scmp.lt.s32.totalorder %s4149_s19, %s4149_s19 }
0x1eba   :  { %5302 = vmatpush3.bf16.msra.mxu1 %v5301_v49 }
0x1ebb   :  { %5559 = vpow2.f32 %v4229_v13  ;;  %5303 = vmatprep.subr.bf16.mxu1 %v5594_v47 }
0x1ebe   :  { %5305 = vmatpush3.bf16.msra.mxu1 %v5304_v44 }
0x1ec3   :  { %v5558_v63 = vpop.eup %5557 }
0x1ec4   :  { %4049 = vrot.lane.b32.xlu0 %v5558_v63, %s5593_s1 }
0x1ec5   :  { %v5560_v46 = vpop.eup %5559 }
0x1ec6   :  { %v4043_v15 = vadd.f32 1.0, %v5560_v46 }
0x1ec8   :  { %5561 = vrcp.f32 %v4043_v15 }
0x1ed2   :  { %v5562_v4 = vpop.eup %5561 }
0x1ed3   :  { %v4047_v55 = vmul.f32 %v5562_v4, %v3539_v25 }
0x1f36   :  { %v4050_v56 = vpop.permute.xlu0 %4049 }
0x1f37   :  { %v4052_v54 = vmul.f32 %v5562_v4, %v4050_v56 }
0x1f39   :  { %4054 = vrot.lane.b32.xlu1 %v4052_v54, %s5598_s28 }
0x1fab   :  { %v4055_v50 = vpop.permute.xlu1 %4054 }
0x1fac   :  { %v4057_v58 = vadd.f32 %v4055_v50, %v4047_v55 }
0x1fae   :  { %5563 = vtanh.f32 %v4057_v58 }
0x1fb8   :  { %v5564_v62 = vpop.eup %5563 }
0x1fb9   :  { %4060 = vrot.lane.b32.xlu0 %v5564_v62, %s5593_s1  ;;  %s5567_s1 = scalar_lea.vmem %s4149_s19, 32 }
0x1fba   :  { %p5568_p0 = scmp.ne.s32.totalorder %s4149_s19, %s5567_s1  ;;  %p5573_p2 = scmp.lt.s32.totalorder %s5567_s1, %s5567_s1 }
0x1fbc   :  { %p5574_p3 = por %p5573_p2, %p5572_p1 }
0x1fbe   :  { %p5575_p4 = pnand %p5574_p3, %p5568_p0 }
0x202b   :  { %v4061_v42 = vpop.permute.xlu0 %4060 }
0x202c   :  { %v4063_v0 = vmul.f32 %v5562_v4, %v4061_v42 }
0x202e   :  { %4065 = vrot.lane.b32.xlu1 %v4063_v0, %s5598_s28 }
0x20a0   :  { %v4066_v3 = vpop.permute.xlu1 %4065 }
0x20a1   :  { %5002 = vmatmul.mubr.msk.f32.vlgmr.msra.gmra.mrb[4].mxu1 %vm236_vm3, %v4066_v3 }
0x2174   :  { %v4135_v48 = vpop.f32.mrb[4].mxu1 }
0x2175   :  { %v5306_v47 = vadd.f32 %v4167_v41, %v4135_v48  ;;  %v5003_v9 = vpop.f32.mrb[5].mxu1 }
0x2177   :  { %4141 = vst.msk [vmem:[#allocation2] sm:$0x3] %vm4140_vm4, %v5306_v47 }
0x2178   :  { %5578 = shalt.err (!%p5575_p4)
}
0x2179   :  { %s5579_s7 = scalar_lea.hbm %s6461_s12, 32 }
0x217a   :  { %p5580_p5 = scmp.ne.s32.totalorder %s6461_s12, %s5579_s7  ;;  %p5583_p6 = scmp.lt.u32.totalorder %s5579_s7, %s6461_s12 }
0x217c   :  { %p5585_p7 = pnand %p5583_p6, %p5580_p5 }
0x217e   :  { %5588 = shalt.err (!%p5585_p7)
}
0x217f   :  { %4151 = dma.vmem_to_hbm [thread:$0]  %s4149_s19, 32, %s6461_s12, [#allocation3]  }
0x2180   :  { %5589 = dma.done.wait [#allocation3], 32  }
0x2181   :  { %5590 = vsyncadd [#allocation3], 4294967264 }
0x2182   :  { %4155 = vsyncpa [#allocation3], 1 }

</bundles_post_ra>
